<compile_context>
chip_gen: v7x
topology: tpu7x:2x2x1
jax: 0.10.0
libtpu: 0.0.40
codegen_flags: <defaults>
</compile_context>

<pallas_src>
import functools
import math

import jax
import jax.numpy as jnp
from jax.experimental import pallas as pl
from jax.experimental.pallas import tpu as pltpu

F32 = jnp.float32
BF16 = jnp.bfloat16

_VMEM_LIMIT = None
_GATHER_PROBE_CACHE = {}


# ----------------------------------------------------------------------------
# Small helpers
# ----------------------------------------------------------------------------
def _round_up(n, m):
    return (n + m - 1) // m * m


def _pick_tile(n):
    """Largest 8-aligned query tile that divides n (<=256)."""
    for cand in (256, 128, 64, 32, 16, 8):
        if n % cand == 0:
            return cand
    # TODO(synk): production nq (e.g. 900) should be padded to a multiple of
    # 128 (with masked padded keys) by the caller for aligned tiles.
    return n


def _vmem_limit_bytes():
    global _VMEM_LIMIT
    if _VMEM_LIMIT is None:
        try:
            cap = int(pltpu.get_tpu_info().vmem_capacity_bytes)
        except Exception:
            cap = 128 * 1024 * 1024
        # ~75% of physical VMEM, capped at 96 MB (=> ~48 MB on v7x, 96 MB on v5e/v6e)
        _VMEM_LIMIT = int(min(96 * 1024 * 1024, cap * 3 // 4))
    return _VMEM_LIMIT


def _cparams(n_axes):
    return pltpu.CompilerParams(
        dimension_semantics=("parallel",) * n_axes,
        vmem_limit_bytes=_vmem_limit_bytes())


def _rep_spec(shape):
    """Full-array block reused at every grid step (weights / packed biases)."""
    zeros = (0,) * len(shape)

    def imap(*_):
        return zeros

    return pl.BlockSpec(tuple(shape), imap)


# ----------------------------------------------------------------------------
# In-kernel helpers (traced inside Pallas kernels)
# ----------------------------------------------------------------------------
def _layer_norm(x, g, b, eps=1e-5):
    mu = jnp.mean(x, axis=-1, keepdims=True)
    var = jnp.mean((x - mu) ** 2, axis=-1, keepdims=True)
    return (x - mu) * jax.lax.rsqrt(var + eps) * g + b


def _mha_core(q, k, v, bias, n_heads):
    """q (tq,d), k/v (Lk,d) f32; bias broadcastable to (H,tq,Lk) or None.

    Heads are handled by a single reshape + leading-head einsums (no per-head
    slice/stack/concat); the head merge is one reshape feeding the caller's
    output projection.  Returns (tq, d) f32.
    """
    tq, d = q.shape
    lk = k.shape[0]
    dh = d // n_heads
    scale = 1.0 / math.sqrt(dh)
    qh = jnp.swapaxes((q * scale).reshape(tq, n_heads, dh), 0, 1).astype(BF16)
    kh = jnp.swapaxes(k.reshape(lk, n_heads, dh), 0, 1).astype(BF16)
    vh = jnp.swapaxes(v.reshape(lk, n_heads, dh), 0, 1).astype(BF16)
    s = jnp.einsum("hqd,hkd->hqk", qh, kh, preferred_element_type=F32)
    if bias is not None:
        s = s + bias
    m = jnp.max(s, axis=-1, keepdims=True)
    p = jnp.exp(s - m)
    attn = (p * pl.reciprocal(jnp.sum(p, axis=-1, keepdims=True),
                              approx=True)).astype(BF16)
    o = jnp.einsum("hqk,hkd->hqd", attn, vh, preferred_element_type=F32)
    return jnp.swapaxes(o, 0, 1).reshape(tq, d)


def _gather_rows_take(v, idx_col):
    """Row gather: v (N, C) f32, idx_col (M, 1) i32 -> (M, C)."""
    idx_b = jnp.broadcast_to(idx_col, (idx_col.shape[0], v.shape[1]))
    return jnp.take_along_axis(v, idx_b, axis=0)


def _gather_rows_onehot(v, idx_col):
    """Fallback row gather via one-hot matmul (correct, slower at large N)."""
    n = v.shape[0]
    iota = jax.lax.broadcasted_iota(jnp.int32, (idx_col.shape[0], n), 1)
    oh = (idx_col == iota).astype(F32)
    return jnp.dot(oh, v, preferred_element_type=F32)


def _take_gather_supported(len_l, tq, dh):
    """Probe (compile + numeric check) the dynamic-gather lowering at the exact
    shapes used by the deformable kernel; cache the result."""
    key = (int(len_l), int(tq), int(dh))
    if key in _GATHER_PROBE_CACHE:
        return _GATHER_PROBE_CACHE[key]

    def _probe_kernel(v_ref, i_ref, o_ref):
        o_ref[...] = _gather_rows_take(v_ref[...], i_ref[...])

    ok = False
    try:
        v = jnp.arange(len_l, dtype=F32)[:, None] + jnp.zeros((1, dh), F32)
        idx = ((jnp.arange(tq, dtype=jnp.int32)[:, None] * 7 + 3) % len_l)
        out = pl.pallas_call(
            _probe_kernel,
            out_shape=jax.ShapeDtypeStruct((tq, dh), F32))(v, idx)
        out = jax.block_until_ready(out)
        expect = idx.astype(F32) + jnp.zeros((1, dh), F32)
        ok = bool(jnp.all(out == expect))
    except Exception:
        ok = False
    _GATHER_PROBE_CACHE[key] = ok
    return ok


# ----------------------------------------------------------------------------
# Fused kernels (one per sub-layer)
# ----------------------------------------------------------------------------
def _self_attn_kernel(*refs, n_heads, has_mask, eps=1e-5):
    # misc rows: 0=bq 1=bk 2=bv 3=bo 4=ln_g 5=ln_b
    if has_mask:
        (tgt_t_ref, pos_t_ref, tgt_f_ref, pos_f_ref, mask_ref,
         wq_ref, wk_ref, wv_ref, wo_ref, misc_ref, o_ref) = refs
    else:
        (tgt_t_ref, pos_t_ref, tgt_f_ref, pos_f_ref,
         wq_ref, wk_ref, wv_ref, wo_ref, misc_ref, o_ref) = refs
        mask_ref = None

    tgt_t = tgt_t_ref[0]                                     # (tq, d) f32
    q_in = (tgt_t + pos_t_ref[0]).astype(BF16)
    k_in = (tgt_f_ref[0] + pos_f_ref[0]).astype(BF16)        # (nq, d)
    v_in = tgt_f_ref[0].astype(BF16)

    q = jnp.dot(q_in, wq_ref[...], preferred_element_type=F32) + misc_ref[0:1, :]
    k = jnp.dot(k_in, wk_ref[...], preferred_element_type=F32) + misc_ref[1:2, :]
    v = jnp.dot(v_in, wv_ref[...], preferred_element_type=F32) + misc_ref[2:3, :]

    bias = mask_ref[...][None, :, :] if has_mask else None
    attn = _mha_core(q, k, v, bias, n_heads)                 # (tq, d)
    out = (jnp.dot(attn.astype(BF16), wo_ref[...], preferred_element_type=F32)
           + misc_ref[3:4, :])
    o_ref[0] = _layer_norm(tgt_t + out, misc_ref[4:5, :], misc_ref[5:6, :], eps)


def _cross_text_kernel(*refs, n_heads, has_bias, eps=1e-5):
    if has_bias:
        (tgt_t_ref, pos_t_ref, mem_ref, bias_ref,
         wq_ref, wk_ref, wv_ref, wo_ref, misc_ref, o_ref) = refs
    else:
        (tgt_t_ref, pos_t_ref, mem_ref,
         wq_ref, wk_ref, wv_ref, wo_ref, misc_ref, o_ref) = refs
        bias_ref = None

    tgt_t = tgt_t_ref[0]                                     # (tq, d) f32
    q_in = (tgt_t + pos_t_ref[0]).astype(BF16)
    mem = mem_ref[0]                                         # (Lt, d) bf16

    q = jnp.dot(q_in, wq_ref[...], preferred_element_type=F32) + misc_ref[0:1, :]
    k = jnp.dot(mem, wk_ref[...], preferred_element_type=F32) + misc_ref[1:2, :]
    v = jnp.dot(mem, wv_ref[...], preferred_element_type=F32) + misc_ref[2:3, :]

    bias = bias_ref[0][None, :, :] if has_bias else None     # (1,1,Lt)
    attn = _mha_core(q, k, v, bias, n_heads)
    out = (jnp.dot(attn.astype(BF16), wo_ref[...], preferred_element_type=F32)
           + misc_ref[3:4, :])
    o_ref[0] = _layer_norm(tgt_t + out, misc_ref[4:5, :], misc_ref[5:6, :], eps)


def _value_proj_kernel(mem_ref, keep_ref, wv_ref, bv_ref, o_ref):
    """Deformable-attention value projection + key-padding zeroing, head-major.

    Runs once per (batch, head) -- NOT per query tile.
    """
    v = (jnp.dot(mem_ref[0], wv_ref[0], preferred_element_type=F32)
         + bv_ref[0])                                        # (Len, dh) f32
    o_ref[0, 0] = v * keep_ref[0]                            # zero masked rows


def _deform_block_kernel(tgt_ref, pos_ref, ref_ref, v_ref,
                         w_samp_ref, b_samp_ref, w_out_ref, misc_ref, o_ref, *,
                         n_heads, n_points, spatial_shapes, level_starts,
                         use_take_gather, eps=1e-5):
    # misc rows: 0=output_proj_b 1=ln_g 2=ln_b
    H, P = n_heads, n_points
    L = len(spatial_shapes)
    LP = L * P
    HLP = H * LP
    gather = _gather_rows_take if use_take_gather else _gather_rows_onehot

    tgt = tgt_ref[0]                                         # (tq, d) f32
    tq, d = tgt.shape
    dh = d // H

    # one fused projection for sampling offsets (x, y) and attention weights
    q = (tgt + pos_ref[0]).astype(BF16)
    samp = (jnp.dot(q, w_samp_ref[...], preferred_element_type=F32)
            + b_samp_ref[...])                               # (tq, 3*H*L*P)
    offx = samp[:, 0 * HLP:1 * HLP]                          # inner order (H,L,P)
    offy = samp[:, 1 * HLP:2 * HLP]
    awl = samp[:, 2 * HLP:3 * HLP]

    refp = ref_ref[0]                                        # (tq, 2L): [x_l, y_l]*L

    head_outs = []
    for h in range(H):
        # softmax over (levels x points) for this head (MSDeformAttn semantics)
        a_h = awl[:, h * LP:(h + 1) * LP]
        m = jnp.max(a_h, axis=-1, keepdims=True)
        e = jnp.exp(a_h - m)
        a_h = e * pl.reciprocal(jnp.sum(e, axis=-1, keepdims=True), approx=True)

        acc = jnp.zeros((tq, dh), F32)
        for l, (hl, wl) in enumerate(spatial_shapes):
            start = level_starts[l]
            len_l = hl * wl
            vl = v_ref[0, h, start:start + len_l, :]         # (len_l, dh) f32
            c0 = h * LP + l * P
            ox = offx[:, c0:c0 + P]                          # (tq, P)
            oy = offy[:, c0:c0 + P]
            aa = a_h[:, l * P:(l + 1) * P]
            rx = refp[:, 2 * l:2 * l + 1]                    # (tq, 1)
            ry = refp[:, 2 * l + 1:2 * l + 2]
            # grid_sample(align_corners=False): pixel = ref*size + off - 0.5
            x = rx * wl + ox - 0.5
            y = ry * hl + oy - 0.5
            x0 = jnp.floor(x)
            y0 = jnp.floor(y)
            dx = x - x0
            dy = y - y0
            x0i = x0.astype(jnp.int32)
            y0i = y0.astype(jnp.int32)
            for cy in (0, 1):
                for cx in (0, 1):
                    xi = x0i + cx
                    yi = y0i + cy
                    wgt = aa * (dy if cy else 1.0 - dy) * (dx if cx else 1.0 - dx)
                    valid = (xi >= 0) & (xi < wl) & (yi >= 0) & (yi < hl)
                    wgt = jnp.where(valid, wgt, 0.0)
                    # clamp so out-of-bounds (zero-weighted) indices never read OOB
                    idx = (jnp.clip(yi, 0, hl - 1) * wl
                           + jnp.clip(xi, 0, wl - 1))        # (tq, P) i32
                    for pp in range(P):
                        g = gather(vl, idx[:, pp:pp + 1])    # (tq, dh) real gather
                        acc = acc + wgt[:, pp:pp + 1] * g
        head_outs.append(acc)

    sampled = jnp.concatenate(head_outs, axis=-1)            # (tq, d)
    out = (jnp.dot(sampled.astype(BF16), w_out_ref[...],
                   preferred_element_type=F32) + misc_ref[0:1, :])
    o_ref[0] = _layer_norm(tgt + out, misc_ref[1:2, :], misc_ref[2:3, :], eps)


def _ffn_kernel(x_ref, w1_ref, b1_ref, w2_ref, misc_ref, o_ref, *, eps=1e-5):
    # misc rows: 0=b2 1=ln_g 2=ln_b
    x = x_ref[...]                                           # (rt, d) f32
    h = jnp.dot(x.astype(BF16), w1_ref[...], preferred_element_type=F32) + b1_ref[...]
    h = jnp.maximum(h, 0.0)                                  # ReLU
    y = (jnp.dot(h.astype(BF16), w2_ref[...], preferred_element_type=F32)
         + misc_ref[0:1, :])
    o_ref[...] = _layer_norm(x + y, misc_ref[1:2, :], misc_ref[2:3, :], eps)


# ----------------------------------------------------------------------------
# Wrappers (one pallas_call per sub-layer)
# ----------------------------------------------------------------------------
def self_attn_block(wp, tgt_b, pos_b, sa_mask, *, n_heads, tq):
    B, nq, d = tgt_b.shape
    n_qt = nq // tq
    tile = lambda bb, qi: (bb, qi, 0)
    full = lambda bb, qi: (bb, 0, 0)

    has_mask = sa_mask is not None
    operands = [tgt_b, pos_b, tgt_b, pos_b]
    in_specs = [pl.BlockSpec((1, tq, d), tile), pl.BlockSpec((1, tq, d), tile),
                pl.BlockSpec((1, nq, d), full), pl.BlockSpec((1, nq, d), full)]
    if has_mask:
        operands.append(sa_mask)
        in_specs.append(pl.BlockSpec((tq, nq), lambda bb, qi: (qi, 0)))
    for arr in (wp["wq"], wp["wk"], wp["wv"], wp["wo"], wp["misc"]):
        operands.append(arr)
        in_specs.append(_rep_spec(arr.shape))

    return pl.pallas_call(
        functools.partial(_self_attn_kernel, n_heads=n_heads, has_mask=has_mask),
        grid=(B, n_qt),
        in_specs=in_specs,
        out_specs=pl.BlockSpec((1, tq, d), tile),
        out_shape=jax.ShapeDtypeStruct((B, nq, d), F32),
        compiler_params=_cparams(2),
    )(*operands)


def cross_text_block(wp, tgt_b, pos_b, mem_text_bf, text_bias, *, n_heads, tq):
    B, nq, d = tgt_b.shape
    Lt = mem_text_bf.shape[1]
    n_qt = nq // tq
    tile = lambda bb, qi: (bb, qi, 0)
    full = lambda bb, qi: (bb, 0, 0)

    has_bias = text_bias is not None
    operands = [tgt_b, pos_b, mem_text_bf]
    in_specs = [pl.BlockSpec((1, tq, d), tile), pl.BlockSpec((1, tq, d), tile),
                pl.BlockSpec((1, Lt, d), full)]
    if has_bias:
        operands.append(text_bias)
        in_specs.append(pl.BlockSpec((1, 1, Lt), full))
    for arr in (wp["wq"], wp["wk"], wp["wv"], wp["wo"], wp["misc"]):
        operands.append(arr)
        in_specs.append(_rep_spec(arr.shape))

    return pl.pallas_call(
        functools.partial(_cross_text_kernel, n_heads=n_heads, has_bias=has_bias),
        grid=(B, n_qt),
        in_specs=in_specs,
        out_specs=pl.BlockSpec((1, tq, d), tile),
        out_shape=jax.ShapeDtypeStruct((B, nq, d), F32),
        compiler_params=_cparams(2),
    )(*operands)


def value_proj_block(dp, mem_b_bf, keep, *, n_heads):
    B, Len, d = mem_b_bf.shape
    dh = d // n_heads
    return pl.pallas_call(
        _value_proj_kernel,
        grid=(B, n_heads),
        in_specs=[pl.BlockSpec((1, Len, d), lambda bb, h: (bb, 0, 0)),
                  pl.BlockSpec((1, Len, 1), lambda bb, h: (bb, 0, 0)),
                  pl.BlockSpec((1, d, dh), lambda bb, h: (h, 0, 0)),
                  pl.BlockSpec((1, 1, dh), lambda bb, h: (h, 0, 0))],
        out_specs=pl.BlockSpec((1, 1, Len, dh), lambda bb, h: (bb, h, 0, 0)),
        out_shape=jax.ShapeDtypeStruct((B, n_heads, Len, dh), F32),
        compiler_params=_cparams(2),
    )(mem_b_bf, keep, dp["w_val"], dp["b_val"])


def deform_attn_block(dp, tgt_b, pos_b, ref_b, v_heads, spatial_shapes,
                      level_start_index, *, n_heads, n_points, tq):
    B, nq, d = tgt_b.shape
    Len, dh = v_heads.shape[2], v_heads.shape[3]
    n_qt = nq // tq
    shapes_t = tuple((int(a), int(b)) for a, b in spatial_shapes)
    starts_t = tuple(int(s) for s in level_start_index)
    # TODO(synk): production level_start offsets should be padded to multiples
    # of 8 (sublane alignment) and, at very large Len, the value slab should be
    # passed bf16 / tiled per level to respect v7x's 64 MiB VMEM.

    use_take = all(_take_gather_supported(hl * wl, tq, dh) for hl, wl in shapes_t)

    tile = lambda bb, qi: (bb, qi, 0)
    operands = [tgt_b, pos_b, ref_b, v_heads,
                dp["w_samp"], dp["b_samp"], dp["w_out"], dp["misc"]]
    in_specs = [pl.BlockSpec((1, tq, d), tile),
                pl.BlockSpec((1, tq, d), tile),
                pl.BlockSpec((1, tq, ref_b.shape[-1]), tile),
                pl.BlockSpec((1, n_heads, Len, dh), lambda bb, qi: (bb, 0, 0, 0))]
    in_specs += [_rep_spec(a.shape) for a in operands[4:]]

    def _run(take_flag):
        kernel = functools.partial(
            _deform_block_kernel, n_heads=n_heads, n_points=n_points,
            spatial_shapes=shapes_t, level_starts=starts_t,
            use_take_gather=take_flag)
        return pl.pallas_call(
            kernel,
            grid=(B, n_qt),
            in_specs=in_specs,
            out_specs=pl.BlockSpec((1, tq, d), tile),
            out_shape=jax.ShapeDtypeStruct((B, nq, d), F32),
            compiler_params=_cparams(2),
        )(*operands)

    if use_take:
        try:
            return _run(True)
        except Exception:
            pass  # TODO(synk): gather lowering unavailable -> one-hot fallback
    return _run(False)


def ffn_block(wp, x):
    R, d = x.shape
    rt = 256 if R >= 256 else _round_up(R, 8)
    R_pad = _round_up(R, rt)
    xp = x if R_pad == R else jnp.pad(x, ((0, R_pad - R), (0, 0)))
    operands = [xp, wp["w1"], wp["b1"], wp["w2"], wp["misc"]]
    in_specs = [pl.BlockSpec((rt, d), lambda i: (i, 0))]
    in_specs += [_rep_spec(a.shape) for a in operands[1:]]
    y = pl.pallas_call(
        _ffn_kernel,
        grid=(R_pad // rt,),
        in_specs=in_specs,
        out_specs=pl.BlockSpec((rt, d), lambda i: (i, 0)),
        out_shape=jax.ShapeDtypeStruct((R_pad, d), F32),
        compiler_params=_cparams(1),
    )(*operands)
    return y[:R] if R_pad != R else y


# ----------------------------------------------------------------------------
# One-time weight preparation (call ONCE per decoder stack, not per forward)
# ----------------------------------------------------------------------------
def prepare_layer_params(p, *, n_heads, n_levels, n_points):
    d = p["norm2_g"].shape[0]
    H, L, P = n_heads, n_levels, n_points
    dh = d // H
    HLP = H * L * P

    def mha_pack(mp, ln_g, ln_b):
        misc = jnp.stack([mp["bq"], mp["bk"], mp["bv"], mp["bo"], ln_g, ln_b],
                         axis=0).astype(F32)                 # (6, d)
        return dict(wq=mp["wq"].astype(BF16), wk=mp["wk"].astype(BF16),
                    wv=mp["wv"].astype(BF16), wo=mp["wo"].astype(BF16),
                    misc=misc)

    ca = p["cross_attn"]
    w_off = ca["sampling_offsets_w"].reshape(d, H, L, P, 2)
    b_off = ca["sampling_offsets_b"].reshape(H, L, P, 2)
    w_aw = ca["attention_weights_w"].reshape(d, H, L, P)
    b_aw = ca["attention_weights_b"].reshape(H, L, P)
    w_samp = jnp.concatenate(
        [w_off[..., 0].reshape(d, HLP), w_off[..., 1].reshape(d, HLP),
         w_aw.reshape(d, HLP)], axis=1).astype(BF16)          # (d, 3*H*L*P)
    b_samp = jnp.concatenate(
        [b_off[..., 0].reshape(HLP), b_off[..., 1].reshape(HLP),
         b_aw.reshape(HLP)]).reshape(1, 3 * HLP).astype(F32)

    deform = dict(
        w_samp=w_samp, b_samp=b_samp,
        w_val=ca["value_proj_w"].reshape(d, H, dh).transpose(1, 0, 2).astype(BF16),
        b_val=ca["value_proj_b"].reshape(H, 1, dh).astype(F32),
        w_out=ca["output_proj_w"].astype(BF16),
        misc=jnp.stack([ca["output_proj_b"], p["norm1_g"], p["norm1_b"]],
                       axis=0).astype(F32))

    ffn = dict(
        w1=p["linear1_w"].astype(BF16),
        b1=p["linear1_b"].reshape(1, -1).astype(F32),
        w2=p["linear2_w"].astype(BF16),
        misc=jnp.stack([p["linear2_b"], p["norm3_g"], p["norm3_b"]],
                       axis=0).astype(F32))

    return dict(
        d_model=d, n_heads=H, n_levels=L, n_points=P,
        self_attn=mha_pack(p["self_attn"], p["norm2_g"], p["norm2_b"]),
        ca_text=mha_pack(p["ca_text"], p["catext_norm_g"], p["catext_norm_b"]),
        deform=deform, ffn=ffn)


# ----------------------------------------------------------------------------
# Decoder layer forward
# ----------------------------------------------------------------------------
def decoder_layer_forward(prep, tgt, tgt_query_pos, tgt_reference_points,
                          memory_text, text_attention_mask,
                          memory, memory_key_padding_mask,
                          memory_spatial_shapes, memory_level_start_index,
                          self_attn_mask=None):
    H = prep["n_heads"]
    P = prep["n_points"]
    nq, bs, d = tgt.shape

    # ---- per-forward prep (for an N-layer stack, hoist the memory transpose /
    # casts / mask conversions out of the per-layer path) ----
    tgt_b = jnp.transpose(tgt, (1, 0, 2)).astype(F32)
    pos_b = jnp.transpose(tgt_query_pos, (1, 0, 2)).astype(F32)
    ref_b = jnp.transpose(tgt_reference_points, (1, 0, 2, 3)).reshape(bs, nq, -1).astype(F32)
    mem_b = jnp.transpose(memory, (1, 0, 2)).astype(BF16)
    mem_text_b = memory_text.astype(BF16)
    Len = mem_b.shape[1]

    tq = _pick_tile(nq)

    sa_mask = None
    if self_attn_mask is not None:
        if jnp.issubdtype(self_attn_mask.dtype, jnp.bool_):
            sa_mask = jnp.where(self_attn_mask, -1e30, 0.0).astype(F32)
        else:
            sa_mask = self_attn_mask.astype(F32)
    text_bias = None
    if text_attention_mask is not None:
        text_bias = jnp.where(text_attention_mask, -1e30, 0.0).astype(F32)[:, None, :]
    if memory_key_padding_mask is not None:
        keep = (1.0 - memory_key_padding_mask.astype(F32))[:, :, None]
    else:
        keep = jnp.ones((bs, Len, 1), F32)

    # 1) self-attention + dropout(identity) + norm2
    tgt_b = self_attn_block(prep["self_attn"], tgt_b, pos_b, sa_mask,
                            n_heads=H, tq=tq)

    # 2) text cross-attention + catext_norm
    tgt_b = cross_text_block(prep["ca_text"], tgt_b, pos_b, mem_text_b,
                             text_bias, n_heads=H, tq=tq)

    # 3) deformable cross-attention + norm1
    #    (value projection + padding zeroing hoisted: computed once per forward)
    v_heads = value_proj_block(prep["deform"], mem_b, keep, n_heads=H)
    tgt_b = deform_attn_block(prep["deform"], tgt_b, pos_b, ref_b, v_heads,
                              memory_spatial_shapes, memory_level_start_index,
                              n_heads=H, n_points=P, tq=tq)

    # 4) FFN + norm3 (row-tiled, 8-aligned / padded tiles)
    y = ffn_block(prep["ffn"], tgt_b.reshape(bs * nq, d))
    return jnp.transpose(y.reshape(bs, nq, d), (1, 0, 2))


# ----------------------------------------------------------------------------
# Deterministic parameter init (synthetic weights, shapes from __init__)
# ----------------------------------------------------------------------------
def init_params(key, d_model, d_ffn, n_heads, n_levels, n_points):
    keys = iter(jax.random.split(key, 40))

    def w(shape, scale=0.02):
        return jax.random.normal(next(keys), shape, jnp.float32) * scale

    def mha_params():
        return dict(
            wq=w((d_model, d_model)), bq=w((d_model,)),
            wk=w((d_model, d_model)), bk=w((d_model,)),
            wv=w((d_model, d_model)), bv=w((d_model,)),
            wo=w((d_model, d_model)), bo=w((d_model,)),
        )

    n_off = n_heads * n_levels * n_points * 2
    n_aw = n_heads * n_levels * n_points
    params = dict(
        self_attn=mha_params(),
        ca_text=mha_params(),
        cross_attn=dict(
            sampling_offsets_w=w((d_model, n_off)), sampling_offsets_b=w((n_off,)),
            attention_weights_w=w((d_model, n_aw)), attention_weights_b=w((n_aw,)),
            value_proj_w=w((d_model, d_model)), value_proj_b=w((d_model,)),
            output_proj_w=w((d_model, d_model)), output_proj_b=w((d_model,)),
        ),
        linear1_w=w((d_model, d_ffn)), linear1_b=w((d_ffn,)),
        linear2_w=w((d_ffn, d_model)), linear2_b=w((d_model,)),
        norm1_g=jnp.ones((d_model,), jnp.float32), norm1_b=jnp.zeros((d_model,), jnp.float32),
        norm2_g=jnp.ones((d_model,), jnp.float32), norm2_b=jnp.zeros((d_model,), jnp.float32),
        norm3_g=jnp.ones((d_model,), jnp.float32), norm3_b=jnp.zeros((d_model,), jnp.float32),
        catext_norm_g=jnp.ones((d_model,), jnp.float32),
        catext_norm_b=jnp.zeros((d_model,), jnp.float32),
    )
    return params


# ----------------------------------------------------------------------------
if __name__ == "__main__":
    d_model, d_ffn, n_heads, n_levels, n_points = 32, 64, 4, 2, 2
    nq, bs, Lt = 8, 2, 8
    spatial_shapes = ((8, 8), (4, 4))            # (H, W) per level
    level_start_index = (0, 64)
    Len = sum(h * w for h, w in spatial_shapes)  # 80

    key = jax.random.PRNGKey(0)
    kp, kd = jax.random.split(key)
    params = init_params(kp, d_model, d_ffn, n_heads, n_levels, n_points)
    # Hoisted once per decoder stack (weight packing, bf16 casts).
    prep = prepare_layer_params(params, n_heads=n_heads, n_levels=n_levels,
                                n_points=n_points)

    dk = jax.random.split(kd, 8)
    tgt = jax.random.normal(dk[0], (nq, bs, d_model), jnp.float32)
    tgt_query_pos = jax.random.normal(dk[1], (nq, bs, d_model), jnp.float32)
    tgt_reference_points = jax.random.uniform(dk[2], (nq, bs, n_levels, 2),
                                              minval=0.1, maxval=0.9)
    memory_text = jax.random.normal(dk[3], (bs, Lt, d_model), jnp.float32)
    # True = ignore key (standard nn.MultiheadAttention key_padding_mask semantics)
    text_attention_mask = jnp.array(
        [[False] * Lt, [False] * (Lt - 2) + [True, True]], dtype=bool)
    memory = jax.random.normal(dk[4], (Len, bs, d_model), jnp.float32)
    memory_key_padding_mask = jnp.zeros((bs, Len), bool).at[1, -8:].set(True)

    # TODO(synk): dropout layers are identity here (inference mode); training-time
    # stochastic dropout is not implemented.
    out = decoder_layer_forward(
        prep, tgt, tgt_query_pos, tgt_reference_points,
        memory_text, text_attention_mask,
        memory, memory_key_padding_mask,
        spatial_shapes, level_start_index,
        self_attn_mask=None)

    out = jax.block_until_ready(out)
    assert out.shape == (nq, bs, d_model)
    assert bool(jnp.all(jnp.isfinite(out)))
    print("KERNEL_OK")
</pallas_src>

<mosaic_0001>
module attributes {stable_mosaic.version = 11 : i64} {
  func.func @_self_attn_kernel(%arg0: i32, %arg1: i32, %arg2: memref<1x8x32xf32, #tpu.memory_space<vmem>>, %arg3: memref<1x8x32xf32, #tpu.memory_space<vmem>>, %arg4: memref<1x8x32xf32, #tpu.memory_space<vmem>>, %arg5: memref<1x8x32xf32, #tpu.memory_space<vmem>>, %arg6: memref<32x32xbf16, #tpu.memory_space<vmem>>, %arg7: memref<32x32xbf16, #tpu.memory_space<vmem>>, %arg8: memref<32x32xbf16, #tpu.memory_space<vmem>>, %arg9: memref<32x32xbf16, #tpu.memory_space<vmem>>, %arg10: memref<6x32xf32, #tpu.memory_space<vmem>>, %arg11: memref<1x8x32xf32, #tpu.memory_space<vmem>>) attributes {dimension_semantics = [#tpu.dimension_semantics<parallel>, #tpu.dimension_semantics<parallel>], iteration_bounds = array<i64: 2, 1>, scalar_prefetch = 0 : i64, scratch_operands = 0 : i64, tpu.core_type = #tpu.core_type<tc>, window_params = [{transform_indices = @transform_0, window_bounds = array<i64: 1, 8, 32>}, {transform_indices = @transform_1, window_bounds = array<i64: 1, 8, 32>}, {transform_indices = @transform_2, window_bounds = array<i64: 1, 8, 32>}, {transform_indices = @transform_3, window_bounds = array<i64: 1, 8, 32>}, {pipeline_mode = #tpu.pipeline_mode<synchronous>, transform_indices = @transform_4, window_bounds = array<i64: 32, 32>}, {pipeline_mode = #tpu.pipeline_mode<synchronous>, transform_indices = @transform_5, window_bounds = array<i64: 32, 32>}, {pipeline_mode = #tpu.pipeline_mode<synchronous>, transform_indices = @transform_6, window_bounds = array<i64: 32, 32>}, {pipeline_mode = #tpu.pipeline_mode<synchronous>, transform_indices = @transform_7, window_bounds = array<i64: 32, 32>}, {pipeline_mode = #tpu.pipeline_mode<synchronous>, transform_indices = @transform_8, window_bounds = array<i64: 6, 32>}, {transform_indices = @transform_9, window_bounds = array<i64: 1, 8, 32>}]} {
    %c0 = arith.constant 0 : index
    %c0_0 = arith.constant 0 : index
    %c0_1 = arith.constant 0 : index
    %0 = vector.load %arg2[%c0, %c0_0, %c0_1] : memref<1x8x32xf32, #tpu.memory_space<vmem>>, vector<1x8x32xf32>
    %1 = vector.shape_cast %0 : vector<1x8x32xf32> to vector<8x32xf32>
    %c0_2 = arith.constant 0 : index
    %c0_3 = arith.constant 0 : index
    %c0_4 = arith.constant 0 : index
    %2 = vector.load %arg3[%c0_2, %c0_3, %c0_4] : memref<1x8x32xf32, #tpu.memory_space<vmem>>, vector<1x8x32xf32>
    %3 = vector.shape_cast %2 : vector<1x8x32xf32> to vector<8x32xf32>
    %4 = arith.addf %1, %3 : vector<8x32xf32>
    %5 = arith.truncf %4 : vector<8x32xf32> to vector<8x32xbf16>
    %c0_5 = arith.constant 0 : index
    %c0_6 = arith.constant 0 : index
    %c0_7 = arith.constant 0 : index
    %6 = vector.load %arg4[%c0_5, %c0_6, %c0_7] : memref<1x8x32xf32, #tpu.memory_space<vmem>>, vector<1x8x32xf32>
    %7 = vector.shape_cast %6 : vector<1x8x32xf32> to vector<8x32xf32>
    %c0_8 = arith.constant 0 : index
    %c0_9 = arith.constant 0 : index
    %c0_10 = arith.constant 0 : index
    %8 = vector.load %arg5[%c0_8, %c0_9, %c0_10] : memref<1x8x32xf32, #tpu.memory_space<vmem>>, vector<1x8x32xf32>
    %9 = vector.shape_cast %8 : vector<1x8x32xf32> to vector<8x32xf32>
    %10 = arith.addf %7, %9 : vector<8x32xf32>
    %11 = arith.truncf %10 : vector<8x32xf32> to vector<8x32xbf16>
    %c0_11 = arith.constant 0 : index
    %c0_12 = arith.constant 0 : index
    %c0_13 = arith.constant 0 : index
    %12 = vector.load %arg4[%c0_11, %c0_12, %c0_13] : memref<1x8x32xf32, #tpu.memory_space<vmem>>, vector<1x8x32xf32>
    %13 = vector.shape_cast %12 : vector<1x8x32xf32> to vector<8x32xf32>
    %14 = arith.truncf %13 : vector<8x32xf32> to vector<8x32xbf16>
    %c0_14 = arith.constant 0 : index
    %c0_15 = arith.constant 0 : index
    %15 = vector.load %arg6[%c0_14, %c0_15] : memref<32x32xbf16, #tpu.memory_space<vmem>>, vector<32x32xbf16>
    %cst = arith.constant dense<0.000000e+00> : vector<8x32xf32>
    %16 = tpu.matmul %5, %15, %cst {dimension_numbers = #tpu.dot_dimension_numbers<[1], [0], [0], [1], [0, 0, 1, 1], [], []>} : vector<8x32xbf16>, vector<32x32xbf16>, vector<8x32xf32> -> vector<8x32xf32>
    %c0_16 = arith.constant 0 : index
    %c0_17 = arith.constant 0 : index
    %17 = vector.load %arg10[%c0_16, %c0_17] : memref<6x32xf32, #tpu.memory_space<vmem>>, vector<1x32xf32>
    %18 = vector.broadcast %17 : vector<1x32xf32> to vector<8x32xf32>
    %19 = arith.addf %16, %18 : vector<8x32xf32>
    %c0_18 = arith.constant 0 : index
    %c0_19 = arith.constant 0 : index
    %20 = vector.load %arg7[%c0_18, %c0_19] : memref<32x32xbf16, #tpu.memory_space<vmem>>, vector<32x32xbf16>
    %cst_20 = arith.constant dense<0.000000e+00> : vector<8x32xf32>
    %21 = tpu.matmul %11, %20, %cst_20 {dimension_numbers = #tpu.dot_dimension_numbers<[1], [0], [0], [1], [0, 0, 1, 1], [], []>} : vector<8x32xbf16>, vector<32x32xbf16>, vector<8x32xf32> -> vector<8x32xf32>
    %c1 = arith.constant 1 : index
    %c0_21 = arith.constant 0 : index
    %22 = vector.load %arg10[%c1, %c0_21] : memref<6x32xf32, #tpu.memory_space<vmem>>, vector<1x32xf32>
    %23 = vector.broadcast %22 : vector<1x32xf32> to vector<8x32xf32>
    %24 = arith.addf %21, %23 : vector<8x32xf32>
    %c0_22 = arith.constant 0 : index
    %c0_23 = arith.constant 0 : index
    %25 = vector.load %arg8[%c0_22, %c0_23] : memref<32x32xbf16, #tpu.memory_space<vmem>>, vector<32x32xbf16>
    %cst_24 = arith.constant dense<0.000000e+00> : vector<8x32xf32>
    %26 = tpu.matmul %14, %25, %cst_24 {dimension_numbers = #tpu.dot_dimension_numbers<[1], [0], [0], [1], [0, 0, 1, 1], [], []>} : vector<8x32xbf16>, vector<32x32xbf16>, vector<8x32xf32> -> vector<8x32xf32>
    %c2 = arith.constant 2 : index
    %c0_25 = arith.constant 0 : index
    %27 = vector.load %arg10[%c2, %c0_25] : memref<6x32xf32, #tpu.memory_space<vmem>>, vector<1x32xf32>
    %28 = vector.broadcast %27 : vector<1x32xf32> to vector<8x32xf32>
    %29 = arith.addf %26, %28 : vector<8x32xf32>
    %cst_26 = arith.constant 0.353553385 : f32
    %30 = vector.broadcast %cst_26 : f32 to vector<8x32xf32>
    %31 = arith.mulf %19, %30 : vector<8x32xf32>
    %32 = vector.shape_cast %31 : vector<8x32xf32> to vector<8x4x8xf32>
    %33 = tpu.transpose %32, [1, 0, 2] : vector<8x4x8xf32> -> vector<4x8x8xf32>
    %34 = arith.truncf %33 : vector<4x8x8xf32> to vector<4x8x8xbf16>
    %35 = vector.shape_cast %24 : vector<8x32xf32> to vector<8x4x8xf32>
    %36 = tpu.transpose %35, [1, 0, 2] : vector<8x4x8xf32> -> vector<4x8x8xf32>
    %37 = arith.truncf %36 : vector<4x8x8xf32> to vector<4x8x8xbf16>
    %38 = vector.shape_cast %29 : vector<8x32xf32> to vector<8x4x8xf32>
    %39 = tpu.transpose %38, [1, 0, 2] : vector<8x4x8xf32> -> vector<4x8x8xf32>
    %40 = arith.truncf %39 : vector<4x8x8xf32> to vector<4x8x8xbf16>
    "tpu.trace_start"() <{level = 10 : i32, message = "hqd,hkd->hqk"}> : () -> ()
    %cst_27 = arith.constant dense<0.000000e+00> : vector<4x8x8xf32>
    %41 = tpu.matmul %34, %37, %cst_27 {dimension_numbers = #tpu.dot_dimension_numbers<[2], [2], [1], [1], [0, 0, 0, 1, 1, 1], [0], [0]>} : vector<4x8x8xbf16>, vector<4x8x8xbf16>, vector<4x8x8xf32> -> vector<4x8x8xf32>
    "tpu.trace_stop"() : () -> ()
    %cst_28 = arith.constant dense<0xFF800000> : vector<4x8xf32>
    %42 = vector.multi_reduction <maximumf>, %41, %cst_28 [2] : vector<4x8x8xf32> to vector<4x8xf32>
    %43 = vector.shape_cast %42 : vector<4x8xf32> to vector<4x8x1xf32>
    %44 = vector.broadcast %43 : vector<4x8x1xf32> to vector<4x8x8xf32>
    %45 = arith.subf %41, %44 : vector<4x8x8xf32>
    %46 = math.exp %45 : vector<4x8x8xf32>
    %cst_29 = arith.constant dense<0.000000e+00> : vector<4x8xf32>
    %47 = vector.multi_reduction <add>, %46, %cst_29 [2] : vector<4x8x8xf32> to vector<4x8xf32>
    %48 = vector.shape_cast %47 : vector<4x8xf32> to vector<4x8x1xf32>
    %49 = tpu.reciprocal %48 {approx = true} : vector<4x8x1xf32> -> vector<4x8x1xf32>
    %50 = vector.broadcast %49 : vector<4x8x1xf32> to vector<4x8x8xf32>
    %51 = arith.mulf %46, %50 : vector<4x8x8xf32>
    %52 = arith.truncf %51 : vector<4x8x8xf32> to vector<4x8x8xbf16>
    "tpu.trace_start"() <{level = 10 : i32, message = "hqk,hkd->hqd"}> : () -> ()
    %cst_30 = arith.constant dense<0.000000e+00> : vector<4x8x8xf32>
    %53 = tpu.matmul %52, %40, %cst_30 {dimension_numbers = #tpu.dot_dimension_numbers<[2], [1], [1], [2], [0, 0, 0, 1, 1, 2], [0], [0]>} : vector<4x8x8xbf16>, vector<4x8x8xbf16>, vector<4x8x8xf32> -> vector<4x8x8xf32>
    "tpu.trace_stop"() : () -> ()
    %54 = tpu.transpose %53, [1, 0, 2] : vector<4x8x8xf32> -> vector<8x4x8xf32>
    %55 = vector.shape_cast %54 : vector<8x4x8xf32> to vector<8x32xf32>
    %56 = arith.truncf %55 : vector<8x32xf32> to vector<8x32xbf16>
    %c0_31 = arith.constant 0 : index
    %c0_32 = arith.constant 0 : index
    %57 = vector.load %arg9[%c0_31, %c0_32] : memref<32x32xbf16, #tpu.memory_space<vmem>>, vector<32x32xbf16>
    %cst_33 = arith.constant dense<0.000000e+00> : vector<8x32xf32>
    %58 = tpu.matmul %56, %57, %cst_33 {dimension_numbers = #tpu.dot_dimension_numbers<[1], [0], [0], [1], [0, 0, 1, 1], [], []>} : vector<8x32xbf16>, vector<32x32xbf16>, vector<8x32xf32> -> vector<8x32xf32>
    %c3 = arith.constant 3 : index
    %c0_34 = arith.constant 0 : index
    %59 = vector.load %arg10[%c3, %c0_34] : memref<6x32xf32, #tpu.memory_space<vmem>>, vector<1x32xf32>
    %60 = vector.broadcast %59 : vector<1x32xf32> to vector<8x32xf32>
    %61 = arith.addf %58, %60 : vector<8x32xf32>
    %62 = arith.addf %1, %61 : vector<8x32xf32>
    %c4 = arith.constant 4 : index
    %c0_35 = arith.constant 0 : index
    %63 = vector.load %arg10[%c4, %c0_35] : memref<6x32xf32, #tpu.memory_space<vmem>>, vector<1x32xf32>
    %c5 = arith.constant 5 : index
    %c0_36 = arith.constant 0 : index
    %64 = vector.load %arg10[%c5, %c0_36] : memref<6x32xf32, #tpu.memory_space<vmem>>, vector<1x32xf32>
    %cst_37 = arith.constant dense<0.000000e+00> : vector<8xf32>
    %65 = vector.multi_reduction <add>, %62, %cst_37 [1] : vector<8x32xf32> to vector<8xf32>
    %66 = vector.shape_cast %65 : vector<8xf32> to vector<8x1xf32>
    %cst_38 = arith.constant 3.200000e+01 : f32
    %67 = vector.broadcast %cst_38 : f32 to vector<8x1xf32>
    %68 = arith.divf %66, %67 : vector<8x1xf32>
    %69 = vector.broadcast %68 : vector<8x1xf32> to vector<8x32xf32>
    %70 = arith.subf %62, %69 : vector<8x32xf32>
    %71 = arith.mulf %70, %70 : vector<8x32xf32>
    %cst_39 = arith.constant dense<0.000000e+00> : vector<8xf32>
    %72 = vector.multi_reduction <add>, %71, %cst_39 [1] : vector<8x32xf32> to vector<8xf32>
    %73 = vector.shape_cast %72 : vector<8xf32> to vector<8x1xf32>
    %cst_40 = arith.constant 3.200000e+01 : f32
    %74 = vector.broadcast %cst_40 : f32 to vector<8x1xf32>
    %75 = arith.divf %73, %74 : vector<8x1xf32>
    %76 = vector.broadcast %68 : vector<8x1xf32> to vector<8x32xf32>
    %77 = arith.subf %62, %76 : vector<8x32xf32>
    %cst_41 = arith.constant 9.99999974E-6 : f32
    %78 = vector.broadcast %cst_41 : f32 to vector<8x1xf32>
    %79 = arith.addf %75, %78 : vector<8x1xf32>
    %80 = math.rsqrt %79 : vector<8x1xf32>
    %81 = vector.broadcast %80 : vector<8x1xf32> to vector<8x32xf32>
    %82 = arith.mulf %77, %81 : vector<8x32xf32>
    %83 = vector.broadcast %63 : vector<1x32xf32> to vector<8x32xf32>
    %84 = arith.mulf %82, %83 : vector<8x32xf32>
    %85 = vector.broadcast %64 : vector<1x32xf32> to vector<8x32xf32>
    %86 = arith.addf %84, %85 : vector<8x32xf32>
    %c0_42 = arith.constant 0 : index
    %c0_43 = arith.constant 0 : index
    %c0_44 = arith.constant 0 : index
    %87 = vector.load %arg11[%c0_42, %c0_43, %c0_44] : memref<1x8x32xf32, #tpu.memory_space<vmem>>, vector<1x8x32xf32>
    %88 = vector.shape_cast %87 : vector<1x8x32xf32> to vector<8x32xf32>
    %89 = vector.shape_cast %86 : vector<8x32xf32> to vector<1x8x32xf32>
    tpu.vector_store %arg11[%c0_42, %c0_43, %c0_44], %89 {strides = array<i32>} : memref<1x8x32xf32, #tpu.memory_space<vmem>>, vector<1x8x32xf32>,
    return
  }
  func.func @transform_0(%arg0: i32, %arg1: i32) -> (i32, i32, i32) {
    %c0_i32 = arith.constant 0 : i32
    %c0_i32_0 = arith.constant 0 : i32
    return %arg0, %arg1, %c0_i32 : i32, i32, i32
  }
  func.func @transform_1(%arg0: i32, %arg1: i32) -> (i32, i32, i32) {
    %c0_i32 = arith.constant 0 : i32
    %c0_i32_0 = arith.constant 0 : i32
    return %arg0, %arg1, %c0_i32 : i32, i32, i32
  }
  func.func @transform_2(%arg0: i32, %arg1: i32) -> (i32, i32, i32) {
    %c0_i32 = arith.constant 0 : i32
    %c0_i32_0 = arith.constant 0 : i32
    %c0_i32_1 = arith.constant 0 : i32
    return %arg0, %c0_i32, %c0_i32_0 : i32, i32, i32
  }
  func.func @transform_3(%arg0: i32, %arg1: i32) -> (i32, i32, i32) {
    %c0_i32 = arith.constant 0 : i32
    %c0_i32_0 = arith.constant 0 : i32
    %c0_i32_1 = arith.constant 0 : i32
    return %arg0, %c0_i32, %c0_i32_0 : i32, i32, i32
  }
  func.func @transform_4(%arg0: i32, %arg1: i32) -> (i32, i32) {
    %c0_i32 = arith.constant 0 : i32
    %c0_i32_0 = arith.constant 0 : i32
    %c0_i32_1 = arith.constant 0 : i32
    return %c0_i32, %c0_i32_0 : i32, i32
  }
  func.func @transform_5(%arg0: i32, %arg1: i32) -> (i32, i32) {
    %c0_i32 = arith.constant 0 : i32
    %c0_i32_0 = arith.constant 0 : i32
    %c0_i32_1 = arith.constant 0 : i32
    return %c0_i32, %c0_i32_0 : i32, i32
  }
  func.func @transform_6(%arg0: i32, %arg1: i32) -> (i32, i32) {
    %c0_i32 = arith.constant 0 : i32
    %c0_i32_0 = arith.constant 0 : i32
    %c0_i32_1 = arith.constant 0 : i32
    return %c0_i32, %c0_i32_0 : i32, i32
  }
  func.func @transform_7(%arg0: i32, %arg1: i32) -> (i32, i32) {
    %c0_i32 = arith.constant 0 : i32
    %c0_i32_0 = arith.constant 0 : i32
    %c0_i32_1 = arith.constant 0 : i32
    return %c0_i32, %c0_i32_0 : i32, i32
  }
  func.func @transform_8(%arg0: i32, %arg1: i32) -> (i32, i32) {
    %c0_i32 = arith.constant 0 : i32
    %c0_i32_0 = arith.constant 0 : i32
    %c0_i32_1 = arith.constant 0 : i32
    return %c0_i32, %c0_i32_0 : i32, i32
  }
  func.func @transform_9(%arg0: i32, %arg1: i32) -> (i32, i32, i32) {
    %c0_i32 = arith.constant 0 : i32
    %c0_i32_0 = arith.constant 0 : i32
    return %arg0, %arg1, %c0_i32 : i32, i32, i32
  }
}

</mosaic_0001>

<bundles_post_ra>
// kernel: tpu_custom_call.1
= control target key start
LH: loop header
LB: loop body
LE: loop exit
PB: predicated region body
PF: predicated region fallthrough
CT: control target
= control target key end

     0   :  { %s3462_s0 = inlined_call_operand.hbm [shape: f32[2,8,32], index: 0, kind: input, shape index: {}]   ;;  %s3463_s1 = inlined_call_operand.hbm [shape: f32[2,8,32], index: 1, kind: input, shape index: {}]   ;;  %s3464_s2 = inlined_call_operand.hbm [shape: f32[2,8,32], index: 2, kind: input, shape index: {}]   ;;  %s3465_s3 = inlined_call_operand.hbm [shape: f32[2,8,32], index: 3, kind: input, shape index: {}]   ;;  %s3466_s4 = inlined_call_operand.hbm [shape: bf16[32,32], index: 4, kind: input, shape index: {}]   ;;  %s3467_s5 = inlined_call_operand.hbm [shape: bf16[32,32], index: 5, kind: input, shape index: {}]   ;;  %s3468_s6 = inlined_call_operand.hbm [shape: bf16[32,32], index: 6, kind: input, shape index: {}]   ;;  %s3469_s7 = inlined_call_operand.hbm [shape: bf16[32,32], index: 7, kind: input, shape index: {}]   ;;  %s3470_s8 = inlined_call_operand.hbm [shape: f32[6,32], index: 8, kind: input, shape index: {}]   ;;  %s3471_s9 = inlined_call_operand.hbm [shape: f32[2,8,32], index: 9, kind: output, shape index: {}]  }
   0x1   :  { %3494 = sst [smem:[#allocation32_spill]] %s3463_s1 }
   0x2   :  { %3495 = sst [smem:[#allocation33_spill]] %s3466_s4 }
   0x3   :  { %3496 = sst [smem:[#allocation34_spill]] %s3467_s5 }
   0x4   :  { %3497 = sst [smem:[#allocation35_spill]] %s3469_s7 }
   0x5   :  { %3498 = sst [smem:[#allocation36_spill]] %s3471_s9 }
   0x6   :  { %14 = vsyncpa [#allocation3], 0 }
   0x7   :  { %16 = vsyncpa [#allocation3 + $0x1], 0 }
   0x8   :  { %17 = vsyncpa [#allocation6], 0 }
   0x9   :  { %19 = vsyncpa [#allocation6 + $0x1], 0 }
   0xa   :  { %20 = vsyncpa [#allocation9], 0 }
   0xb   :  { %22 = vsyncpa [#allocation9 + $0x1], 0 }
   0xc   :  { %23 = vsyncpa [#allocation12], 0 }
   0xd   :  { %24 = vsyncpa [#allocation15], 0 }
   0xe   :  { %25 = vsyncpa [#allocation4], 0 }
   0xf   :  { %27 = vsyncpa [#allocation4 + $0x1], 0  ;;  %s2849_s30 = smov 0   ;;  %s2851_s10 = smov 0  }
  0x10   :  { %s2853_s11 = smov 0   ;;  %s2855_s12 = smov 0  }
  0x11   :  { %s2857_s13 = smov 0   ;;  %s2859_s14 = smov 0  }
  0x12 LB: > { %3499 = sst [smem:[#allocation25_spill]] %s2755_s30  ;;  %s2880_s15 = sadd.s32 4294967295, %s2775_s14   ;;  %s2775_s14 = sphi %s2859_s14, %s33_s14   ;;  %s2771_s13 = sphi %s2857_s13, %s3548_s13   ;;  %s2767_s12 = sphi %s2855_s12, %s3547_s12   ;;  %s2763_s11 = sphi %s2853_s11, %s3551_s11   ;;  %s2759_s10 = sphi %s2851_s10, %s3550_s10   ;;  %s2755_s30 = sphi %s2849_s30, %s3549_s30  }
  0x13   : > { %3500 = sst [smem:[#allocation26_spill]] %s2767_s12  ;;  %p2075_p0 = scmp.ge.s32.totalorder %s2775_s14, 1 }
  0x14   : > { %3501 = sst [smem:[#allocation27_spill]] %s2771_s13  ;;  %p3474_p1 = scmp.eq.s32.totalorder %s2880_s15, 0 }
  0x15   : > { %p291_p2 = scmp.lt.s32.totalorder %s2775_s14, 3  ;;  %s2777_s17 = smov [#allocation10]  }
  0x16   : > { %s303_s18 = sshll.u32 %s2777_s17, 4  ;;  %s2778_s20 = smov [#allocation11]   ;;  %s2889_s18 = int_to_ptr.vmem [resolvable:$true] %s303_s18 }
  0x17   : > { %p2885_p3 = pnand %p2075_p0, %p291_p2  ;;  %s316_s21 = sshll.u32 %s2778_s20, 4  ;;  %s2900_s21 = int_to_ptr.vmem [resolvable:$true] %s316_s21 }
  0x18   : > { %s2779_s22 = smov [#allocation14]   ;;  %s3505_s4 = sld [smem:[#allocation33_spill]] }
  0x19   : > { %s3502_s16 = scalar_select %p2885_p3, 1, 0 }
  0x1a   : > { %p2277_p4 = pneg %p2885_p3  ;;  %s2902_s23 = sshll.u32 %s2779_s22, 4  ;;  %s343_s23 = int_to_ptr.vmem [resolvable:$true] %s2902_s23 }
  0x1b   : > { %3503 = sst [smem:[#allocation28_spill]] %s3502_s16 }
  0x1c   : > { %p2896_p6 = pnand %p2277_p4, %p3474_p1 }
  0x1e   : > { %s3504_s19 = scalar_select %p2896_p6, 1, 0 }
  0x1f   : > { %s2413_s26 = scalar_lea.hbm %s3505_s4, 256  ;;  %p2912_p8 = pneg %p2896_p6 }
  0x20   : > { %p2414_p7 = scmp.ne.s32.totalorder %s3505_s4, %s2413_s26  ;;  %p2420_p11 = scmp.lt.u32.totalorder %s2413_s26, %s3505_s4 }
  0x21   : > { %s3506_s29 = scalar_select %p2912_p8, 1, 0 }
  0x22   : > { %p2416_p9 = pnand %p2912_p8, %p2414_p7 }
  0x24   : > { %p2417_p10 = pneg %p2416_p9 }
  0x26   : > { %p2422_p12 = pnand %p2420_p11, %p2417_p10 }
  0x28   : > { %2425 = shalt.err (!%p2422_p12)
}
  0x29   : > { %s2426_s22 = scalar_lea.vmem %s2889_s18, 256  ;;  %p2434_p4 = scmp.lt.s32.totalorder %s2889_s18, %s2889_s18 }
  0x2a   : > { %p2427_p13 = scmp.ne.s32.totalorder %s2889_s18, %s2426_s22  ;;  %p2435_p5 = scmp.lt.s32.totalorder %s2426_s22, %s2426_s22 }
  0x2c   : > { %p2429_p0 = pnand %p2427_p13, %p2912_p8  ;;  %p2436_p7 = por %p2435_p5, %p2434_p4 }
  0x2e   : > { %p2430_p2 = pneg %p2429_p0 }
  0x30   : > { %p2437_p9 = pnand %p2436_p7, %p2430_p2 }
  0x32   : > { %2440 = shalt.err (!%p2437_p9)
}
  0x33   : > { %s3476_s24 = smov 64   ;;  %s3477_s25 = smov 4  }
  0x34   : > { %2280 = dma.hbm_to_vmem [thread:$0]  (!%p2896_p6), %s3505_s4, 256, %s2889_s18, [#allocation9], %s3476_s24, %s3476_s24, %s3477_s25  }
  0x35   : > { %s3507_s5 = sld [smem:[#allocation34_spill]] }
  0x3b   : > { %s2441_s20 = scalar_lea.hbm %s3507_s5, 256 }
  0x3c   : > { %p2442_p5 = scmp.ne.s32.totalorder %s3507_s5, %s2441_s20  ;;  %p2448_p12 = scmp.lt.u32.totalorder %s2441_s20, %s3507_s5 }
  0x3e   : > { %p2444_p10 = pnand %p2442_p5, %p2912_p8 }
  0x40   : > { %p2445_p11 = pneg %p2444_p10 }
  0x42   : > { %p2450_p13 = pnand %p2448_p12, %p2445_p11 }
  0x44   : > { %2453 = shalt.err (!%p2450_p13)
}
  0x45   : > { %s2454_s18 = scalar_lea.vmem %s2900_s21, 256  ;;  %p2462_p7 = scmp.lt.s32.totalorder %s2900_s21, %s2900_s21 }
  0x46   : > { %p2455_p0 = scmp.ne.s32.totalorder %s2900_s21, %s2454_s18  ;;  %p2463_p9 = scmp.lt.s32.totalorder %s2454_s18, %s2454_s18 }
  0x48   : > { %p2457_p2 = pnand %p2455_p0, %p2912_p8  ;;  %p2464_p5 = por %p2463_p9, %p2462_p7 }
  0x4a   : > { %p2458_p4 = pneg %p2457_p2 }
  0x4c   : > { %p2465_p10 = pnand %p2464_p5, %p2458_p4 }
  0x4e   : > { %2468 = shalt.err (!%p2465_p10)
}
  0x4f   : > { %2283 = dma.hbm_to_vmem [thread:$0]  (!%p2896_p6), %s3507_s5, 256, %s2900_s21, [#allocation12], %s3476_s24, %s3476_s24, %s3477_s25  }
  0x50   : > { %s3508_s7 = sld [smem:[#allocation35_spill]] }
  0x56   : > { %s2469_s27 = scalar_lea.hbm %s3508_s7, 256 }
  0x57   : > { %p2470_p11 = scmp.ne.s32.totalorder %s3508_s7, %s2469_s27  ;;  %p2476_p0 = scmp.lt.u32.totalorder %s2469_s27, %s3508_s7 }
  0x59   : > { %p2472_p12 = pnand %p2470_p11, %p2912_p8 }
  0x5b   : > { %p2473_p13 = pneg %p2472_p12 }
  0x5d   : > { %p2478_p2 = pnand %p2476_p0, %p2473_p13 }
  0x5f   : > { %2481 = shalt.err (!%p2478_p2)
}
  0x60   : > { %s2482_s18 = scalar_lea.vmem %s343_s23, 256  ;;  %p2490_p5 = scmp.lt.s32.totalorder %s343_s23, %s343_s23 }
  0x61   : > { %p2483_p4 = scmp.ne.s32.totalorder %s343_s23, %s2482_s18  ;;  %p2491_p10 = scmp.lt.s32.totalorder %s2482_s18, %s2482_s18 }
  0x63   : > { %p2485_p7 = pnand %p2483_p4, %p2912_p8  ;;  %p2492_p1 = por %p2491_p10, %p2490_p5 }
  0x65   : > { %p2486_p9 = pneg %p2485_p7 }
  0x67   : > { %p2493_p3 = pnand %p2492_p1, %p2486_p9 }
  0x69   : > { %2496 = shalt.err (!%p2493_p3)
}
  0x6a   : > { %2289 = dma.hbm_to_vmem [thread:$0]  (!%p2896_p6), %s3508_s7, 256, %s343_s23, [#allocation15], %s3476_s24, %s3476_s24, %s3477_s25  }
  0x6b   : > { %s2074_s12 = sadd.s32 4294967294, %s2775_s14   ;;  %s45_s16 = sadd.s32 1, %s2771_s13 }
  0x6c   : > { %s54_s26 = sadd.s32 1, %s2763_s11  ;;  %p47_p1 = scmp.ge.s32.totalorder %s45_s16, 2 }
  0x6d   : > { %p61_p3 = scmp.ne.s32.totalorder %s2763_s11, %s2759_s10  ;;  %p62_p11 = scmp.eq.s32.totalorder %s2775_s14, 0 }
  0x6e   : > { %p67_p12 = scmp.ne.s32.totalorder %s2759_s10, %s2755_s30  ;;  %s3553_s16 = smov (%p47_p1, %s45_s16), 0 }
  0x6f   : > { %3509 = sst [smem:[#allocation29_spill]] %s3553_s16  ;;  %p2994_p13 = por %p62_p11, %p61_p3 }
  0x70   : > { %p3511_p0 = scmp.eq.s32.totalorder %s2880_s15, 0  ;;  %s49_s28 = ssub.s32 %s2771_s13, %s3553_s16 }
  0x71   : > { %p278_p4 = scmp.eq.s32.totalorder %s2880_s15, 1  ;;  %p52_p7 = scmp.eq.s32.totalorder %s49_s28, 0 }
  0x72   : > { %p3000_p2 = por %p3511_p0, %p67_p12  ;;  %p284_p9 = scmp.eq.s32.totalorder %s2074_s12, 1 }
  0x73   : > { %p3007_p5 = por %p278_p4, %p61_p3  ;;  %p2315_p10 = scmp.lt.s32.totalorder %s2775_s14, 2 }
  0x74   : > { %s3512_s23 = scalar_select %p3000_p2, 1, 0 }
  0x75   : > { %s3513_s17 = scalar_select %p3007_p5, 1, 0 }
  0x76   : > { %s3013_s20 = scalar_select %p52_p7, %s2763_s11, %s54_s26  }
  0x77   : > { %p3015_p1 = por %p284_p9, %p67_p12  ;;  %s3478_s18 = sand.u32 1, %s2763_s11  }
  0x78   : > { %3514 = sst [smem:[#allocation30_spill]] %s3013_s20  ;;  %s3022_s21 = sshll.u32 %s3478_s18, 3 }
  0x79   : > { %s3515_s22 = scalar_select %p3015_p1, 1, 0 }
  0x7a   : > { %s3025_s9 = sshll.u32 %s2771_s13, 7  ;;  %p3029_p3 = pnand %p2315_p10, %p2994_p13 }
  0x7b   : > { %3516 = sst [smem:[#allocation31_spill]] %s3515_s22  ;;  %s3482_s26 = sand.u32 1, %s2775_s14  }
  0x7c   : > { %s3517_s12 = scalar_select %p3029_p3, 1, 0 }
  0x7d   : > { %s3518_s1 = sld [smem:[#allocation32_spill]]  ;;  %s390_s18 = scalar_lea.vmem [#allocation5], %s3022_s21 }
  0x7e   : > { %s398_s4 = sshll.u32 %s390_s18, 4  ;;  %s3045_s27 = scalar_lea.sflag [#allocation6], %s3482_s26  ;;  %s3041_s4 = int_to_ptr.vmem [resolvable:$true] %s398_s4 }
  0x7f   : > { %p3051_p12 = pneg %p3029_p3 }
  0x81   : > { %s3519_s7 = scalar_select %p3051_p12, 1, 0 }
  0x83   : > { %s3038_s25 = scalar_lea.hbm %s3518_s1, %s3025_s9  ;;  %s2502_s18 = scalar_lea.hbm %s3518_s1, 256 }
  0x84   : > { %s2497_s5 = scalar_lea.hbm %s3038_s25, 128  ;;  %p2503_p4 = scmp.lt.u32.totalorder %s3038_s25, %s3518_s1 }
  0x85   : > { %p2498_p11 = scmp.ne.s32.totalorder %s3038_s25, %s2497_s5  ;;  %p2504_p7 = scmp.lt.u32.totalorder %s2502_s18, %s2497_s5 }
  0x86   : > { %p2506_p10 = scmp.lt.u32.totalorder %s2497_s5, %s3038_s25 }
  0x87   : > { %p2500_p13 = pnand %p3051_p12, %p2498_p11  ;;  %p2505_p9 = por %p2504_p7, %p2503_p4 }
  0x89   : > { %p2501_p0 = pneg %p2500_p13  ;;  %p2507_p1 = por %p2506_p10, %p2505_p9 }
  0x8b   : > { %p2508_p5 = pnand %p2507_p1, %p2501_p0 }
  0x8d   : > { %2511 = shalt.err (!%p2508_p5)
}
  0x8e   : > { %s2512_s26 = scalar_lea.vmem %s3041_s4, 128  ;;  %s2782_s24 = smov [#allocation5]  }
  0x8f   : > { %p2513_p11 = scmp.ne.s32.totalorder %s3041_s4, %s2512_s26  ;;  %s2517_s28 = sshll.u32 %s2782_s24, 4  ;;  %s2518_s28 = int_to_ptr.vmem [resolvable:$false] %s2517_s28 }
  0x90   : > { %s2519_s13 = scalar_lea.vmem %s2518_s28, 256  ;;  %p2520_p6 = scmp.lt.s32.totalorder %s3041_s4, %s2518_s28 }
  0x91   : > { %p2515_p13 = pnand %p2513_p11, %p3051_p12  ;;  %p2521_p8 = scmp.lt.s32.totalorder %s2519_s13, %s2512_s26 }
  0x93   : > { %p2516_p2 = pneg %p2515_p13  ;;  %p2522_p4 = por %p2521_p8, %p2520_p6 }
  0x95   : > { %p2523_p7 = pnand %p2522_p4, %p2516_p2 }
  0x97   : > { %2526 = shalt.err (!%p2523_p7)
}
  0x98   : > { %2299 = dma.hbm_to_vmem [thread:$0]  (!%p3029_p3), %s3038_s25, 128, %s3041_s4, %s3045_s27  }
  0x99   : > { %s2783_s5 = smov [#allocation13]   ;;  %s2784_s18 = smov [#allocation16]  }
  0x9a   : > { %s329_s16 = sshll.u32 %s2783_s5, 4  ;;  %s356_s1 = sshll.u32 %s2784_s18, 4  ;;  %s330_s16 = int_to_ptr.vmem [resolvable:$true] %s329_s16  ;;  %s357_s1 = int_to_ptr.vmem [resolvable:$true] %s356_s1 }
  0x9b   : > { %s2527_s28 = scalar_lea.hbm %s3468_s6, 256  ;;  %p3520_p8 = scmp.ne.s32.totalorder %s3506_s29, 0 }
  0x9c   : > { %p2528_p6 = scmp.ne.s32.totalorder %s3468_s6, %s2527_s28  ;;  %p2534_p1 = scmp.lt.u32.totalorder %s2527_s28, %s3468_s6 }
  0x9e   : > { %p2530_p2 = pnand %p2528_p6, %p3520_p8 }
  0xa0   : > { %p2531_p5 = pneg %p2530_p2 }
  0xa2   : > { %p2536_p0 = pnand %p2534_p1, %p2531_p5 }
  0xa4   : > { %2539 = shalt.err (!%p2536_p0)
}
  0xa5   : > { %s2540_s4 = scalar_lea.vmem %s330_s16, 256  ;;  %p2548_p13 = scmp.lt.s32.totalorder %s330_s16, %s330_s16 }
  0xa6   : > { %p2541_p9 = scmp.ne.s32.totalorder %s330_s16, %s2540_s4  ;;  %p2549_p4 = scmp.lt.s32.totalorder %s2540_s4, %s2540_s4 }
  0xa8   : > { %p2543_p10 = pnand %p2541_p9, %p3520_p8  ;;  %p2550_p7 = por %p2549_p4, %p2548_p13 }
  0xaa   : > { %p2544_p11 = pneg %p2543_p10 }
  0xac   : > { %p2551_p3 = pnand %p2550_p7, %p2544_p11 }
  0xae   : > { %2554 = shalt.err (!%p2551_p3)
}
  0xaf   : > { %p3521_p6 = scmp.ne.s32.totalorder %s3504_s19, 0  ;;  %s3522_s25 = smov 4  }
  0xb0   : > { %s3523_s20 = smov 64   ;;  %s2555_s24 = scalar_lea.hbm %s3470_s8, 128 }
  0xb1   : > { %2286 = dma.hbm_to_vmem [thread:$0]  (!%p3521_p6), %s3468_s6, 256, %s330_s16, [#allocation12], %s3523_s20, %s3523_s20, %s3522_s25  }
  0xb2   : > { %p2556_p2 = scmp.ne.s32.totalorder %s3470_s8, %s2555_s24  ;;  %p2562_p1 = scmp.lt.u32.totalorder %s2555_s24, %s3470_s8 }
  0xb4   : > { %p2558_p3 = pnand %p2556_p2, %p3520_p8 }
  0xb6   : > { %p2559_p5 = pneg %p2558_p3 }
  0xb8   : > { %p2564_p0 = pnand %p2562_p1, %p2559_p5 }
  0xba   : > { %2567 = shalt.err (!%p2564_p0)
}
  0xbb   : > { %s2568_s30 = scalar_lea.vmem %s357_s1, 128  ;;  %p2576_p13 = scmp.lt.s32.totalorder %s357_s1, %s357_s1 }
  0xbc   : > { %p2569_p9 = scmp.ne.s32.totalorder %s357_s1, %s2568_s30  ;;  %p2577_p4 = scmp.lt.s32.totalorder %s2568_s30, %s2568_s30 }
  0xbe   : > { %p2571_p10 = pnand %p2569_p9, %p3520_p8  ;;  %p2578_p7 = por %p2577_p4, %p2576_p13 }
  0xc0   : > { %p2572_p11 = pneg %p2571_p10 }
  0xc2   : > { %p2579_p12 = pnand %p2578_p7, %p2572_p11 }
  0xc4   : > { %2582 = shalt.err (!%p2579_p12)
}
  0xc5   : > { %2292 = dma.hbm_to_vmem [thread:$0]  (!%p3521_p6), %s3470_s8, 128, %s357_s1, [#allocation15]  }
  0xc6   : > { %s3118_s22 = scalar_lea.hbm %s3462_s0, %s3025_s9  ;;  %s371_s5 = scalar_lea.vmem [#allocation2], %s3022_s21 }
  0xc7   : > { %s379_s19 = sshll.u32 %s371_s5, 4  ;;  %s3127_s28 = scalar_lea.hbm %s3464_s2, %s3025_s9  ;;  %s3121_s19 = int_to_ptr.vmem [resolvable:$true] %s379_s19 }
  0xc8   : > { %s3524_s26 = sand.u32 1, %s2763_s11   ;;  %s2583_s13 = scalar_lea.hbm %s3118_s22, 128 }
  0xc9   : > { %s368_s1 = scalar_lea.sflag [#allocation3], %s3524_s26  ;;  %p2584_p12 = scmp.ne.s32.totalorder %s3118_s22, %s2583_s13 }
  0xca   : > { %p3525_p8 = scmp.ne.s32.totalorder %s3519_s7, 0  ;;  %s2588_s16 = scalar_lea.hbm %s3462_s0, 256 }
  0xcb   : > { %p2589_p3 = scmp.lt.u32.totalorder %s3118_s22, %s3462_s0  ;;  %p2590_p5 = scmp.lt.u32.totalorder %s2588_s16, %s2583_s13 }
  0xcc   : > { %p2586_p6 = pnand %p2584_p12, %p3525_p8  ;;  %p2592_p0 = scmp.lt.u32.totalorder %s2583_s13, %s3118_s22 }
  0xcd   : > { %p2591_p1 = por %p2590_p5, %p2589_p3 }
  0xce   : > { %p2587_p2 = pneg %p2586_p6 }
  0xcf   : > { %p2593_p9 = por %p2592_p0, %p2591_p1 }
  0xd1   : > { %p2594_p10 = pnand %p2593_p9, %p2587_p2 }
  0xd3   : > { %2597 = shalt.err (!%p2594_p10)
}
  0xd4   : > { %s2598_s29 = scalar_lea.vmem %s3121_s19, 128  ;;  %s2785_s5 = smov [#allocation2]  }
  0xd5   : > { %p2599_p11 = scmp.ne.s32.totalorder %s3121_s19, %s2598_s29  ;;  %s2603_s18 = sshll.u32 %s2785_s5, 4  ;;  %s2604_s18 = int_to_ptr.vmem [resolvable:$false] %s2603_s18 }
  0xd6   : > { %s2605_s24 = scalar_lea.vmem %s2604_s18, 256  ;;  %p2606_p7 = scmp.lt.s32.totalorder %s3121_s19, %s2604_s18 }
  0xd7   : > { %p2601_p13 = pnand %p2599_p11, %p3525_p8  ;;  %p2607_p12 = scmp.lt.s32.totalorder %s2605_s24, %s2598_s29 }
  0xd9   : > { %p2602_p4 = pneg %p2601_p13  ;;  %p2608_p6 = por %p2607_p12, %p2606_p7 }
  0xdb   : > { %p2609_p3 = pnand %p2608_p6, %p2602_p4 }
  0xdd   : > { %2612 = shalt.err (!%p2609_p3)
}
  0xde   : > { %p3526_p2 = scmp.ne.s32.totalorder %s3517_s12, 0  ;;  %s409_s26 = scalar_lea.vmem [#allocation7], %s3022_s21 }
  0xdf   : > { %s416_s13 = sshll.u32 %s409_s26, 4  ;;  %s3157_s16 = scalar_lea.hbm %s3465_s3, %s3025_s9  ;;  %s417_s13 = int_to_ptr.vmem [resolvable:$true] %s416_s13 }
  0xe0   : > { %2296 = dma.hbm_to_vmem [thread:$0]  (!%p3526_p2), %s3118_s22, 128, %s3121_s19, %s368_s1  }
  0xe1   : > { %s2613_s25 = scalar_lea.hbm %s3127_s28, 128  ;;  %s2618_s5 = scalar_lea.hbm %s3464_s2, 256 }
  0xe2   : > { %p2614_p5 = scmp.ne.s32.totalorder %s3127_s28, %s2613_s25  ;;  %p2619_p9 = scmp.lt.u32.totalorder %s3127_s28, %s3464_s2 }
  0xe3   : > { %p2620_p10 = scmp.lt.u32.totalorder %s2618_s5, %s2613_s25  ;;  %p2622_p13 = scmp.lt.u32.totalorder %s2613_s25, %s3127_s28 }
  0xe4   : > { %p2616_p1 = pnand %p2614_p5, %p3525_p8 }
  0xe5   : > { %p2621_p11 = por %p2620_p10, %p2619_p9 }
  0xe6   : > { %p2617_p0 = pneg %p2616_p1 }
  0xe7   : > { %p2623_p4 = por %p2622_p13, %p2621_p11 }
  0xe9   : > { %p2624_p7 = pnand %p2623_p4, %p2617_p0 }
  0xeb   : > { %2627 = shalt.err (!%p2624_p7)
}
  0xec   : > { %s2628_s9 = scalar_lea.vmem %s417_s13, 128  ;;  %s2786_s22 = smov [#allocation7]  }
  0xed   : > { %p2629_p12 = scmp.ne.s32.totalorder %s417_s13, %s2628_s9  ;;  %s2633_s19 = sshll.u32 %s2786_s22, 4  ;;  %s2634_s19 = int_to_ptr.vmem [resolvable:$false] %s2633_s19 }
  0xee   : > { %s2635_s1 = scalar_lea.vmem %s2634_s19, 256  ;;  %p2636_p5 = scmp.lt.s32.totalorder %s417_s13, %s2634_s19 }
  0xef   : > { %p2631_p6 = pnand %p2629_p12, %p3525_p8  ;;  %p2637_p1 = scmp.lt.s32.totalorder %s2635_s1, %s2628_s9 }
  0xf1   : > { %p2632_p3 = pneg %p2631_p6  ;;  %p2638_p2 = por %p2637_p1, %p2636_p5 }
  0xf3   : > { %p2639_p9 = pnand %p2638_p2, %p2632_p3 }
  0xf5   : > { %2642 = shalt.err (!%p2639_p9)
}
  0xf6   : > { %p3527_p10 = scmp.ne.s32.totalorder %s3517_s12, 0  ;;  %s427_s26 = scalar_lea.vmem [#allocation8], %s3022_s21 }
  0xf7   : > { %s434_s4 = sshll.u32 %s427_s26, 4  ;;  %s3528_s30 = sand.u32 1, %s2775_s14   ;;  %s435_s4 = int_to_ptr.vmem [resolvable:$true] %s434_s4 }
  0xf8   : > { %2302 = dma.hbm_to_vmem [thread:$0]  (!%p3527_p10), %s3127_s28, 128, %s417_s13, %s3045_s27  }
  0xf9   : > { %s424_s25 = scalar_lea.sflag [#allocation9], %s3528_s30  ;;  %s2643_s20 = scalar_lea.hbm %s3157_s16, 128 }
  0xfa   : > { %p2644_p2 = scmp.ne.s32.totalorder %s3157_s16, %s2643_s20  ;;  %s2648_s18 = scalar_lea.hbm %s3465_s3, 256 }
  0xfb   : > { %p2649_p13 = scmp.lt.u32.totalorder %s3157_s16, %s3465_s3  ;;  %p2650_p4 = scmp.lt.u32.totalorder %s2648_s18, %s2643_s20 }
  0xfc   : > { %p2646_p0 = pnand %p2644_p2, %p3525_p8  ;;  %p2652_p12 = scmp.lt.u32.totalorder %s2643_s20, %s3157_s16 }
  0xfd   : > { %p2651_p7 = por %p2650_p4, %p2649_p13 }
  0xfe   : > { %p2647_p11 = pneg %p2646_p0 }
  0xff   : > { %p2653_p6 = por %p2652_p12, %p2651_p7 }
 0x101   : > { %p2654_p3 = pnand %p2653_p6, %p2647_p11 }
 0x103   : > { %2657 = shalt.err (!%p2654_p3)
}
 0x104   : > { %s2658_s21 = scalar_lea.vmem %s435_s4, 128  ;;  %s2787_s27 = smov [#allocation8]  }
 0x105   : > { %p2659_p5 = scmp.ne.s32.totalorder %s435_s4, %s2658_s21  ;;  %s2663_s28 = sshll.u32 %s2787_s27, 4  ;;  %s2664_s28 = int_to_ptr.vmem [resolvable:$false] %s2663_s28 }
 0x106   : > { %s2665_s13 = scalar_lea.vmem %s2664_s28, 256  ;;  %p2666_p2 = scmp.lt.s32.totalorder %s435_s4, %s2664_s28 }
 0x107   : > { %p2661_p1 = pnand %p2659_p5, %p3525_p8  ;;  %p2667_p0 = scmp.lt.s32.totalorder %s2665_s13, %s2658_s21 }
 0x109   : > { %p2662_p9 = pneg %p2661_p1  ;;  %p2668_p10 = por %p2667_p0, %p2666_p2 }
 0x10b   : > { %p2669_p4 = pnand %p2668_p10, %p2662_p9 }
 0x10d   : > { %2672 = shalt.err (!%p2669_p4)
}
 0x10e   : > { %p3529_p13 = scmp.ne.s32.totalorder %s3517_s12, 0  ;;  %s3530_s22 = sld [smem:[#allocation28_spill]] }
 0x110   : > { %2305 = dma.hbm_to_vmem [thread:$0]  (!%p3529_p13), %s3157_s16, 128, %s435_s4, %s424_s25  }
 0x114   : > { %p3531_p11 = scmp.ne.s32.totalorder %s3530_s22, 0 }
 0x115   : > { %s3200_s7 = sand.u32 (!%p3531_p11), 1, %s2759_s10   ;;  %p3532_p8 = scmp.ne.s32.totalorder (!%p3531_p11), %s3512_s23, 0 }
 0x116   : > { %443 = sbr.rel (%p3531_p11) target bundleno = 2150 (0x866), region = 56  ;;  %s3203_s19 = sshll.u32 (!%p3531_p11), %s3200_s7, 3 }
 0x117   : > { %s446_s1 = scalar_lea.sflag (!%p3531_p11), [#allocation3], %s3200_s7  ;;  %s449_s26 = scalar_lea.vmem (!%p3531_p11), [#allocation2], %s3203_s19 }
 0x11d   : > { %2726 = dma.done.wait (%p3532_p8), %s446_s1, 128  }
 0x11e   : > { %2728 = vsyncadd (%p3532_p8), %s446_s1, 4294967168  ;;  %s454_s12 = sand.u32 1, %s2880_s15   ;;  %s458_s4 = scalar_lea.vmem [#allocation5], %s3203_s19 }
 0x11f   : > { %s455_s16 = scalar_lea.sflag [#allocation6], %s454_s12 }
 0x120   : > { %2730 = dma.done.wait (%p3532_p8), %s455_s16, 256  }
 0x121   : > { %2732 = vsyncadd (%p3532_p8), %s455_s16, 4294967040  ;;  %s467_s30 = scalar_lea.vmem [#allocation7], %s3203_s19  ;;  %s473_s25 = scalar_lea.sflag [#allocation9], %s454_s12 }
 0x122   : > { %s476_s20 = scalar_lea.vmem [#allocation8], %s3203_s19 }
 0x123   : > { %2734 = dma.done.wait (%p3532_p8), %s473_s25, 128  }
 0x124   : > { %2736 = vsyncadd (%p3532_p8), %s473_s25, 4294967168  ;;  %p3533_p10 = scmp.eq.s32.totalorder %s2880_s15, 0 }
 0x126   : > { %2738 = dma.done.wait (%p3533_p10), [#allocation9], 256   ;;  %p3534_p7 = pmov %p3533_p10 }
 0x128   : > { %2740 = vsyncadd (%p3534_p7), [#allocation9], 4294967040  ;;  %p3535_p12 = pmov %p3534_p7 }
 0x129   : > { %p3536_p6 = pmov %p3534_p7 }
 0x12a   : > { %2742 = dma.done.wait (%p3535_p12), [#allocation12], 512  }
 0x12b   : > { %2744 = vsyncadd (%p3536_p6), [#allocation12], 4294966784  ;;  %p3537_p3 = pmov %p3536_p6 }
 0x12d   : > { %2746 = dma.done.wait (%p3537_p3), [#allocation15], 384   ;;  %p3538_p5 = pmov %p3537_p3 }
 0x12e   : > { %v2788_v0 = vmov 0.0   ;;  %vm2789_vm0 = vmmov 0   ;;  %v2387_v1 = vld [vmem:[#allocation11] sm:$0xff]   ;;  %v2388_v2 = vld [vmem:[#allocation10] sm:$0xff]   ;;  %v2389_v3 = vld [vmem:[#allocation11 + $0x8] sm:$0xff]   ;;  %vm577_vm1 = vcmask 261120   ;;  %v765_v31 = vlaneseq }
 0x12f   : > { %2748 = vsyncadd (%p3538_p5), [#allocation15], 4294966912  ;;  %2175 = vmatprep.subr.bf16.mxu1 %v2788_v0  ;;  %2167 = vmatprep.subr.bf16.mxu0 %v2788_v0  ;;  %v2390_v4 = vld [vmem:[#allocation10 + $0x8] sm:$0xff]   ;;  %v552_v6 = vld [vmem:[%s476_s20] sm:$0xff]  ;;  %s2790_s15 = smov 104   ;;  %s2791_s23 = smov 120  }
 0x130   : > { %2179 = vmatprep.mubr.msk.bf16.mxu1 %vm2789_vm0, %v2788_v0  ;;  %2171 = vmatprep.mubr.msk.bf16.mxu0 %vm2789_vm0, %v2788_v0  ;;  %v551_v5 = vld [vmem:[%s467_s30] sm:$0xff]  ;;  %v548_v9 = vld [vmem:[%s458_s4] sm:$0xff]  ;;  %s2792_s29 = smov 112   ;;  %v2793_v29 = vmov 1983009808   ;;  %v766_v35 = vshrl.u32 %v765_v31, 7 }
 0x131   : > { %2176 = vmatpush3.bf16.msra.mxu1 %v2387_v1  ;;  %2168 = vmatpush3.bf16.msra.mxu0 %v2388_v2  ;;  %v3245_v7 = vld [vmem:[%s449_s26] sm:$0xff]  ;;  %v553_v8 = vadd.f32 %v552_v6, %v551_v5  ;;  %v555_v28 = vpack.c.bf16 %v551_v5, %v551_v5  ;;  %v763_v30 = vunpack.c.l.s4 %v2793_v29  ;;  %v2794_v32 = vmov 1934713408   ;;  %s2795_s5 = smov 16   ;;  %s2796_s18 = smov 8  }
 0x132   : > { %2177 = vmatprep.subr.bf16.mxu1 %v2788_v0  ;;  %2169 = vmatprep.subr.bf16.mxu0 %v2788_v0  ;;  %v549_v10 = vadd.f32 %v548_v9, %v3245_v7  ;;  %v2105_v13 = vld [vmem:[#allocation16 + $0x1] ss:$0 sm:$0xff]  ;;  %v2101_v14 = vld [vmem:[#allocation16] ss:$0 sm:$0xff]  ;;  %v2392_v27 = vld [vmem:[#allocation13 + $0x8] sm:$0xff]   ;;  %v795_v33 = vunpack.c.l.s4 %v2794_v32  ;;  %vm1200_vm2 = vcmask 64512  }
 0x133   : > { %v554_v11 = vpack.c.bf16 %v553_v8, %v553_v8  ;;  %v2391_v19 = vld [vmem:[#allocation13] sm:$0xff]   ;;  %v764_v34 = vunpack.c.0.s8 %v763_v30  ;;  %vm1436_vm3 = vcmask 1043456   ;;  %s2797_s24 = smov 24   ;;  %vm1767_vm4 = vcmask 130048   ;;  %s3539_s9 = sld [smem:[#allocation26_spill]] }
 0x134   : > { %v550_v12 = vpack.c.bf16 %v549_v10, %v549_v10  ;;  %v796_v38 = vunpack.c.0.s8 %v795_v33  ;;  %vm1769_vm5 = vcmask 195584   ;;  %s545_s27 = scalar_lea.vmem [#allocation17], %s3203_s19  ;;  %s3540_s1 = sld [smem:[#allocation36_spill]] }
 0x135   : > { %2178 = vmatpush3.bf16.msra.mxu1 %v2389_v3  ;;  %2170 = vmatpush3.bf16.msra.mxu0 %v2390_v4  ;;  %v3269_v39 = vsub.s32 %v764_v34, %v766_v35  ;;  %s1879_s28 = sshll.u32 %s545_s27, 4  ;;  %s1865_s12 = scalar_lea.sflag [#allocation4], %s3200_s7  ;;  %s3414_s28 = int_to_ptr.vmem [resolvable:$true] %s1879_s28 }
 0x136   : > { %2191 = vmatprep.subr.bf16.mxu1 %v2788_v0  ;;  %2183 = vmatprep.subr.bf16.mxu0 %v2788_v0  ;;  %v3271_v46 = vsub.s32 %v796_v38, %v766_v35  ;;  %s2673_s16 = scalar_lea.vmem %s3414_s28, 128  ;;  %p3541_p9 = scmp.ne.s32.totalorder %s3513_s17, 0 }
 0x137   : > { %p2674_p1 = scmp.ne.s32.totalorder %s3414_s28, %s2673_s16  ;;  %s2798_s19 = smov [#allocation17]  }
 0x138   : > { %2180 = vmatmul.mubr.msk.bf16.vlgmr.msra.gmra.mrb[0].mxu1 %vm577_vm1, %v554_v11  ;;  %2172 = vmatmul.mubr.msk.bf16.vlgmr.msra.gmra.mrb[0].mxu0 %vm577_vm1, %v550_v12  ;;  %s2677_s4 = sshll.u32 %s2798_s19, 4  ;;  %s2678_s4 = int_to_ptr.vmem [resolvable:$false] %s2677_s4 }
 0x139   : > { %2193 = vmatprep.mubr.msk.bf16.mxu1 %vm2789_vm0, %v2788_v0  ;;  %2187 = vmatprep.mubr.msk.bf16.mxu0 %vm2789_vm0, %v2788_v0  ;;  %s2136_s21 = sshll.u32 %s3539_s9, 7  ;;  %p2675_p2 = pnand %p2674_p1, %p3541_p9 }
 0x13a   : > { %2184 = vmatpush3.bf16.msra.mxu0 %v2391_v19  ;;  %s3412_s26 = scalar_lea.hbm %s3540_s1, %s2136_s21  ;;  %s2679_s30 = scalar_lea.vmem %s2678_s4, 256 }
 0x13b   : > { %2185 = vmatprep.subr.bf16.mxu0 %v2788_v0  ;;  %p2676_p0 = pneg %p2675_p2  ;;  %p2680_p4 = scmp.lt.s32.totalorder %s3414_s28, %s2678_s4 }
 0x13c   : > { %p2681_p13 = scmp.lt.s32.totalorder %s2679_s30, %s2673_s16 }
 0x13e   : > { %2186 = vmatpush3.bf16.msra.mxu0 %v2392_v27  ;;  %p2682_p11 = por %p2681_p13, %p2680_p4 }
 0x13f   : > { %2197 = vmatprep.subr.bf16.mxu0 %v2788_v0 }
 0x140   : > { %p2683_p8 = pnand %p2682_p11, %p2676_p0 }
 0x141   : > { %2188 = vmatmul.mubr.msk.bf16.vlgmr.msra.gmra.mrb[4].mxu0 %vm577_vm1, %v555_v28 }
 0x142   : > { %2199 = vmatprep.mubr.msk.bf16.mxu0 %vm2789_vm0, %v2788_v0 }
 0x20b   : > { %v679_v15 = vpop.f32.mrb[0].mxu1  ;;  %v615_v18 = vpop.f32.mrb[0].mxu0 }
 0x20c   : > { %v680_v16 = vadd.f32 %v2105_v13, %v679_v15  ;;  %v2181_v17 = vpop.f32.mrb[1].mxu1  ;;  %v616_v20 = vadd.f32 %v2101_v14, %v615_v18  ;;  %v2173_v22 = vpop.f32.mrb[1].mxu0 }
 0x20d   : > { %v682_v21 = vpop.f32.mrb[2].mxu1  ;;  %v618_v24 = vpop.f32.mrb[2].mxu0 }
 0x20e   : > { %907 = vrot.lane.b32.xlu1 %v680_v16, %s2790_s15  ;;  %901 = vrot.lane.b32.xlu0 %v680_v16, %s2791_s23  ;;  %v2182_v23 = vpop.f32.mrb[3].mxu1  ;;  %v749_v25 = vmul.f32 0.35355338, %v616_v20  ;;  %v2174_v26 = vpop.f32.mrb[3].mxu0 }
 0x212   : > { %904 = vrot.lane.b32.xlu0 %v680_v16, %s2792_s29  ;;  %751 = vrot.lane.b32.xlu1 %v749_v25, %s2791_s23 }
 0x216   : > { %754 = vrot.lane.b32.xlu0 %v749_v25, %s2792_s29  ;;  %757 = vrot.lane.b32.xlu1 %v749_v25, %s2790_s15 }
 0x280   : > { %v908_v36 = vpop.permute.xlu1 %907  ;;  %v902_v37 = vpop.permute.xlu0 %901 }
 0x281   : > { %v926_v40 = vcombine.low %v902_v37, %v908_v36  ;;  %v927_v41 = vcombine.high %v902_v37, %v908_v36 }
 0x283   : > { %v934_v47 = vrot.slane %v926_v40, %v3269_v39  ;;  %v941_v48 = vrot.slane %v927_v41, %v3269_v39 }
 0x284   : > { %v905_v42 = vpop.permute.xlu0 %904  ;;  %v752_v43 = vpop.permute.xlu1 %751 }
 0x285   : > { %v910_v44 = vcombine.low %v680_v16, %v905_v42  ;;  %v911_v45 = vcombine.high %v680_v16, %v905_v42 }
 0x287   : > { %v918_v49 = vrot.slane %v910_v44, %v3269_v39  ;;  %v925_v50 = vrot.slane %v911_v45, %v3269_v39 }
 0x288   : > { %v755_v51 = vpop.permute.xlu0 %754  ;;  %v758_v52 = vpop.permute.xlu1 %757 }
 0x289   : > { %v942_v53 = vcombine.low %v918_v49, %v934_v47  ;;  %v943_v54 = vcombine.high %v918_v49, %v934_v47  ;;  %v958_v55 = vcombine.low %v925_v50, %v941_v48  ;;  %v959_v56 = vcombine.high %v925_v50, %v941_v48 }
 0x28a   : > { %v760_v57 = vcombine.low %v749_v25, %v755_v51  ;;  %v761_v58 = vcombine.high %v749_v25, %v755_v51  ;;  %v776_v59 = vcombine.low %v752_v43, %v758_v52  ;;  %v777_v60 = vcombine.high %v752_v43, %v758_v52 }
 0x28b   : > { %v950_v61 = vrot.slane %v942_v53, %v3271_v46  ;;  %v957_v62 = vrot.slane %v943_v54, %v3271_v46  ;;  %v966_v63 = vrot.slane %v958_v55, %v3271_v46  ;;  %v973_v1 = vrot.slane %v959_v56, %v3271_v46 }
 0x28c   : > { %v768_v2 = vrot.slane %v760_v57, %v3269_v39  ;;  %v775_v3 = vrot.slane %v761_v58, %v3269_v39  ;;  %v784_v4 = vrot.slane %v776_v59, %v3269_v39  ;;  %v791_v5 = vrot.slane %v777_v60, %v3269_v39 }
 0x28d   : > { %v978_v6 = vcombine.low %v950_v61, %v957_v62  ;;  %v2115_v8 = vcombine.high %v950_v61, %v957_v62  ;;  %v994_v9 = vcombine.low %v966_v63, %v973_v1  ;;  %v2116_v10 = vcombine.high %v966_v63, %v973_v1 }
 0x28e   : > { %v792_v11 = vcombine.low %v768_v2, %v784_v4  ;;  %v793_v12 = vcombine.high %v768_v2, %v784_v4  ;;  %v808_v13 = vcombine.low %v775_v3, %v791_v5  ;;  %v809_v14 = vcombine.high %v775_v3, %v791_v5 }
 0x28f   : > { %v985_v15 = vrot.slane %v978_v6, %v3269_v39  ;;  %v993_v16 = vrot.slane %v2115_v8, %v3269_v39  ;;  %v1001_v17 = vrot.slane %v994_v9, %v3269_v39  ;;  %v1009_v18 = vrot.slane %v2116_v10, %v3269_v39  ;;  %v743_v6 = vpop.f32.mrb[4].mxu0 }
 0x290   : > { %v800_v19 = vrot.slane %v792_v11, %v3271_v46  ;;  %v807_v20 = vrot.slane %v793_v12, %v3271_v46  ;;  %v816_v21 = vrot.slane %v808_v13, %v3271_v46  ;;  %v823_v22 = vrot.slane %v809_v14, %v3271_v46  ;;  %v2189_v8 = vpop.f32.mrb[5].mxu0 }
 0x291   : > { %v1010_v23 = vcombine.low %v985_v15, %v993_v16  ;;  %v1026_v24 = vcombine.low %v1001_v17, %v1009_v18  ;;  %v1011_v25 = vcombine.high %v985_v15, %v993_v16  ;;  %v1027_v26 = vcombine.high %v1001_v17, %v1009_v18  ;;  %v746_v9 = vpop.f32.mrb[6].mxu0 }
 0x292   : > { %v828_v27 = vcombine.low %v800_v19, %v807_v20  ;;  %v2113_v28 = vcombine.high %v800_v19, %v807_v20  ;;  %v844_v29 = vcombine.low %v816_v21, %v823_v22  ;;  %v2114_v30 = vcombine.high %v816_v21, %v823_v22  ;;  %v2190_v10 = vpop.f32.mrb[7].mxu0 }
 0x293   : > { %v1018_v31 = vrot.slane %v1010_v23, %v3271_v46  ;;  %v1034_v32 = vrot.slane %v1026_v24, %v3271_v46  ;;  %v1025_v40 = vrot.slane %v1011_v25, %v3271_v46  ;;  %v1041_v41 = vrot.slane %v1027_v26, %v3271_v46 }
 0x294   : > { %v835_v33 = vrot.slane %v828_v27, %v3269_v39  ;;  %v843_v34 = vrot.slane %v2113_v28, %v3269_v39  ;;  %v851_v35 = vrot.slane %v844_v29, %v3269_v39  ;;  %v859_v36 = vrot.slane %v2114_v30, %v3269_v39 }
 0x295   : > { %v1042_v37 = vcombine.low %v1018_v31, %v1034_v32  ;;  %v1043_v38 = vcombine.high %v1018_v31, %v1034_v32  ;;  %v1044_v51 = vcombine.low %v1025_v40, %v1041_v41  ;;  %v1045_v52 = vcombine.high %v1025_v40, %v1041_v41  ;;  %v2109_v31 = vld [vmem:[#allocation16 + $0x2] ss:$0 sm:$0xff] }
 0x296   : > { %v860_v42 = vcombine.low %v835_v33, %v843_v34  ;;  %v876_v43 = vcombine.low %v851_v35, %v859_v36  ;;  %v861_v53 = vcombine.high %v835_v33, %v843_v34  ;;  %v877_v54 = vcombine.high %v851_v35, %v859_v36 }
 0x297   : > { %v1046_v44 = vpack.c.bf16 %v1042_v37, %v1042_v37  ;;  %v1047_v45 = vpack.c.bf16 %v1043_v38, %v1043_v38  ;;  %v1048_v57 = vpack.c.bf16 %v1044_v51, %v1044_v51  ;;  %v1049_v58 = vpack.c.bf16 %v1045_v52, %v1045_v52 }
 0x298   : > { %v868_v47 = vrot.slane %v860_v42, %v3271_v46  ;;  %v884_v48 = vrot.slane %v876_v43, %v3271_v46  ;;  %v875_v61 = vrot.slane %v861_v53, %v3271_v46  ;;  %v891_v62 = vrot.slane %v877_v54, %v3271_v46 }
 0x299   : > { %v1205_v49 = vsel %vm1200_vm2, %v1046_v44, 0  ;;  %v1251_v50 = vsel %vm1200_vm2, %v1047_v45, 0  ;;  %v1297_v63 = vsel %vm1200_vm2, %v1048_v57, 0  ;;  %v1343_v1 = vsel %vm1200_vm2, %v1049_v58, 0 }
 0x29a   : > { %2192 = vmatpush3.bf16.xpose.msra.mxu1 %v1205_v49  ;;  %2198 = vmatpush3.bf16.xpose.msra.mxu0 %v1251_v50  ;;  %v892_v55 = vcombine.low %v868_v47, %v884_v48  ;;  %v893_v56 = vcombine.high %v868_v47, %v884_v48  ;;  %v894_v2 = vcombine.low %v875_v61, %v891_v62 }
 0x29b   : > { %2203 = vmatprep.subr.bf16.mxu1 %v2788_v0  ;;  %2209 = vmatprep.subr.bf16.mxu0 %v2788_v0  ;;  %v895_v3 = vcombine.high %v875_v61, %v891_v62  ;;  %v744_v32 = vadd.f32 %v2109_v31, %v743_v6 }
 0x29c   : > { %v896_v59 = vpack.c.bf16 %v892_v55, %v892_v55  ;;  %v897_v60 = vpack.c.bf16 %v893_v56, %v893_v56  ;;  %v898_v4 = vpack.c.bf16 %v894_v2, %v894_v2 }
 0x29d   : > { %v899_v5 = vpack.c.bf16 %v895_v3, %v895_v3 }
 0x2a1   : > { %2194 = vmatmul.mubr.msk.bf16.vlgmr.msra.gmra.mrb[4].mxu1 %vm1200_vm2, %v896_v59  ;;  %2200 = vmatmul.mubr.msk.bf16.vlgmr.msra.gmra.mrb[8].mxu0 %vm1200_vm2, %v897_v60 }
 0x2a2   : > { %2204 = vmatpush3.bf16.xpose.msra.mxu1 %v1297_v63  ;;  %2210 = vmatpush3.bf16.xpose.msra.mxu0 %v1343_v1 }
 0x2a3   : > { %2205 = vmatprep.mubr.msk.bf16.mxu1 %vm2789_vm0, %v2788_v0  ;;  %2211 = vmatprep.mubr.msk.bf16.mxu0 %vm2789_vm0, %v2788_v0 }
 0x2a4   : > { %2215 = vmatprep.subr.bf16.mxu1 %v2788_v0  ;;  %2221 = vmatprep.subr.bf16.mxu0 %v2788_v0 }
 0x2a9   : > { %2206 = vmatmul.mubr.msk.bf16.vlgmr.msra.gmra.mrb[8].mxu1 %vm1200_vm2, %v898_v4  ;;  %2212 = vmatmul.mubr.msk.bf16.vlgmr.msra.gmra.mrb[12].mxu0 %vm1200_vm2, %v899_v5 }
 0x2aa   : > { %2217 = vmatprep.mubr.msk.bf16.mxu1 %vm2789_vm0, %v2788_v0  ;;  %2223 = vmatprep.mubr.msk.bf16.mxu0 %vm2789_vm0, %v2788_v0 }
 0x374   : > { %v1241_v11 = vpop.f32.mrb[4].mxu1  ;;  %v1287_v12 = vpop.f32.mrb[8].mxu0 }
 0x375   : > { %v2195_v13 = vpop.f32.mrb[5].mxu1  ;;  %v2201_v14 = vpop.f32.mrb[9].mxu0  ;;  %v1385_v15 = vsel %vm1200_vm2, %v1241_v11, -inf  ;;  %v1388_v16 = vsel %vm1200_vm2, %v1287_v12, -inf }
 0x376   : > { %1386 = vmax.xlane.f32.xlu0 %v1385_v15  ;;  %v1244_v17 = vpop.f32.mrb[6].mxu1  ;;  %1389 = vmax.xlane.f32.xlu1 %v1388_v16  ;;  %v1290_v18 = vpop.f32.mrb[10].mxu0 }
 0x377   : > { %v2196_v19 = vpop.f32.mrb[7].mxu1  ;;  %v2202_v20 = vpop.f32.mrb[11].mxu0 }
 0x37c   : > { %v1333_v21 = vpop.f32.mrb[8].mxu1  ;;  %v1379_v22 = vpop.f32.mrb[12].mxu0 }
 0x37d   : > { %v2207_v23 = vpop.f32.mrb[9].mxu1  ;;  %v2213_v24 = vpop.f32.mrb[13].mxu0  ;;  %v1391_v25 = vsel %vm1200_vm2, %v1333_v21, -inf  ;;  %v1394_v30 = vsel %vm1200_vm2, %v1379_v22, -inf }
 0x37e   : > { %1392 = vmax.xlane.f32.xlu0 %v1391_v25  ;;  %v1336_v26 = vpop.f32.mrb[10].mxu1  ;;  %v1382_v27 = vpop.f32.mrb[14].mxu0 }
 0x37f   : > { %v2208_v28 = vpop.f32.mrb[11].mxu1  ;;  %v2214_v29 = vpop.f32.mrb[15].mxu0 }
 0x382   : > { %1395 = vmax.xlane.f32.xlu0 %v1394_v30 }
 0x387   : > { %1051 = vrot.lane.b32.xlu1 %v744_v32, %s2791_s23 }
 0x403   : > { %v1387_v33 = vpop.xlane.xlu0 %1386  ;;  %v1390_v34 = vpop.xlane.xlu1 %1389 }
 0x404   : > { %v1397_v35 = vsub.f32 %v1241_v11, %v1387_v33  ;;  %v1398_v36 = vsub.f32 %v1287_v12, %v1390_v34 }
 0x406   : > { %v1401_v37 = vmul.f32 1.442695, %v1397_v35  ;;  %v1403_v38 = vmul.f32 1.442695, %v1398_v36 }
 0x407   : > { %v1052_v55 = vpop.permute.xlu1 %1051 }
 0x408   : > { %2395 = vpow2.f32 %v1401_v37 }
 0x409   : > { %2397 = vpow2.f32 %v1403_v38 }
 0x40b   : > { %v1393_v44 = vpop.xlane.xlu0 %1392 }
 0x40c   : > { %v1399_v47 = vsub.f32 %v1333_v21, %v1393_v44 }
 0x40e   : > { %v1405_v49 = vmul.f32 1.442695, %v1399_v47 }
 0x40f   : > { %v1396_v45 = vpop.xlane.xlu0 %1395 }
 0x410   : > { %v1400_v48 = vsub.f32 %v1379_v22, %v1396_v45  ;;  %2399 = vpow2.f32 %v1405_v49 }
 0x412   : > { %v3330_v40 = vpop.eup %2395  ;;  %v1407_v50 = vmul.f32 1.442695, %v1400_v48 }
 0x413   : > { %v3332_v41 = vpop.eup %2397  ;;  %v1409_v42 = vsel %vm1200_vm2, %v3330_v40, 0.0 }
 0x414   : > { %1410 = vadd.xlane.f32.xlu1 %v1409_v42  ;;  %v1412_v43 = vsel %vm1200_vm2, %v3332_v41, 0.0  ;;  %2401 = vpow2.f32 %v1407_v50 }
 0x415   : > { %1413 = vadd.xlane.f32.xlu0 %v1412_v43 }
 0x41a   : > { %v3340_v51 = vpop.eup %2399 }
 0x41b   : > { %v1415_v53 = vsel %vm1200_vm2, %v3340_v51, 0.0 }
 0x41e   : > { %v3342_v52 = vpop.eup %2401 }
 0x41f   : > { %v1418_v54 = vsel %vm1200_vm2, %v3342_v52, 0.0 }
 0x425   : > { %1057 = vrot.lane.b32.xlu1 %v744_v32, %s2790_s15 }
 0x42b   : > { %1054 = vrot.lane.b32.xlu0 %v744_v32, %s2792_s29 }
 0x449   : > { %1416 = vadd.xlane.f32.xlu1 %v1415_v53 }
 0x44a   : > { %1419 = vadd.xlane.f32.xlu0 %v1418_v54 }
 0x4a1   : > { %v1411_v56 = vpop.xlane.xlu1 %1410 }
 0x4a2   : > { %v1414_v57 = vpop.xlane.xlu0 %1413  ;;  %2403 = vrcp.f32 %v1411_v56 }
 0x4a3   : > { %2405 = vrcp.f32 %v1414_v57 }
 0x4a5   : > { %v1058_v58 = vpop.permute.xlu1 %1057 }
 0x4a6   : > { %v1076_v59 = vcombine.low %v1052_v55, %v1058_v58  ;;  %v1077_v60 = vcombine.high %v1052_v55, %v1058_v58  ;;  %v1055_v61 = vpop.permute.xlu0 %1054 }
 0x4a7   : > { %v1060_v62 = vcombine.low %v744_v32, %v1055_v61  ;;  %v1061_v63 = vcombine.high %v744_v32, %v1055_v61 }
 0x4a8   : > { %v1084_v1 = vrot.slane %v1076_v59, %v3269_v39  ;;  %v1091_v2 = vrot.slane %v1077_v60, %v3269_v39 }
 0x4a9   : > { %v1068_v3 = vrot.slane %v1060_v62, %v3269_v39  ;;  %v1075_v4 = vrot.slane %v1061_v63, %v3269_v39 }
 0x4ab   : > { %v1092_v5 = vcombine.low %v1068_v3, %v1084_v1  ;;  %v1093_v6 = vcombine.high %v1068_v3, %v1084_v1  ;;  %v1108_v8 = vcombine.low %v1075_v4, %v1091_v2  ;;  %v1109_v9 = vcombine.high %v1075_v4, %v1091_v2 }
 0x4ac   : > { %v2404_v28 = vpop.eup %2403 }
 0x4ad   : > { %v1100_v10 = vrot.slane %v1092_v5, %v3271_v46  ;;  %v1107_v11 = vrot.slane %v1093_v6, %v3271_v46  ;;  %v1116_v12 = vrot.slane %v1108_v8, %v3271_v46  ;;  %v1123_v13 = vrot.slane %v1109_v9, %v3271_v46  ;;  %v2406_v31 = vpop.eup %2405 }
 0x4ae   : > { %v1425_v36 = vmul.f32 %v2404_v28, %v3330_v40  ;;  %v1426_v37 = vmul.f32 %v2406_v31, %v3332_v41 }
 0x4af   : > { %v1128_v14 = vcombine.low %v1100_v10, %v1107_v11  ;;  %v2117_v15 = vcombine.high %v1100_v10, %v1107_v11  ;;  %v1144_v16 = vcombine.low %v1116_v12, %v1123_v13  ;;  %v2118_v17 = vcombine.high %v1116_v12, %v1123_v13 }
 0x4b0   : > { %v1429_v48 = vpack.c.bf16 %v1425_v36, %v1425_v36  ;;  %v1430_v49 = vpack.c.bf16 %v1426_v37, %v1426_v37 }
 0x4b1   : > { %v1135_v18 = vrot.slane %v1128_v14, %v3269_v39  ;;  %v1143_v19 = vrot.slane %v2117_v15, %v3269_v39  ;;  %v1151_v20 = vrot.slane %v1144_v16, %v3269_v39  ;;  %v1159_v21 = vrot.slane %v2118_v17, %v3269_v39 }
 0x4b3   : > { %v1160_v22 = vcombine.low %v1135_v18, %v1143_v19  ;;  %v1161_v23 = vcombine.high %v1135_v18, %v1143_v19  ;;  %v1176_v24 = vcombine.low %v1151_v20, %v1159_v21  ;;  %v1177_v25 = vcombine.high %v1151_v20, %v1159_v21 }
 0x4b5   : > { %v1168_v26 = vrot.slane %v1160_v22, %v3271_v46  ;;  %v1175_v27 = vrot.slane %v1161_v23, %v3271_v46  ;;  %v1184_v29 = vrot.slane %v1176_v24, %v3271_v46  ;;  %v1191_v30 = vrot.slane %v1177_v25, %v3271_v46  ;;  %v2393_v24 = vld [vmem:[#allocation14] sm:$0xff]  }
 0x4b7   : > { %v1192_v32 = vcombine.low %v1168_v26, %v1184_v29  ;;  %v1193_v33 = vcombine.high %v1168_v26, %v1184_v29  ;;  %v1194_v34 = vcombine.low %v1175_v27, %v1191_v30  ;;  %v1195_v35 = vcombine.high %v1175_v27, %v1191_v30 }
 0x4b9   : > { %v1196_v38 = vpack.c.bf16 %v1192_v32, %v1192_v32  ;;  %v1197_v42 = vpack.c.bf16 %v1193_v33, %v1193_v33  ;;  %v1198_v45 = vpack.c.bf16 %v1194_v34, %v1194_v34  ;;  %v1199_v47 = vpack.c.bf16 %v1195_v35, %v1195_v35  ;;  %v2394_v33 = vld [vmem:[#allocation14 + $0x8] sm:$0xff]  }
 0x4bb   : > { %v1438_v43 = vsel %vm1436_vm3, %v1196_v38, 0  ;;  %v1484_v44 = vsel %vm1436_vm3, %v1197_v42, 0  ;;  %v1530_v40 = vsel %vm1436_vm3, %v1198_v45, 0  ;;  %v1576_v41 = vsel %vm1436_vm3, %v1199_v47, 0 }
 0x4bc   : > { %2216 = vmatpush3.bf16.msra.mxu1 %v1438_v43  ;;  %2222 = vmatpush3.bf16.msra.mxu0 %v1484_v44 }
 0x4bd   : > { %2227 = vmatprep.subr.bf16.mxu1 %v2788_v0  ;;  %2233 = vmatprep.subr.bf16.mxu0 %v2788_v0 }
 0x4bf   : > { %2218 = vmatmul.mubr.msk.bf16.vlgmr.msra.gmra.mrb[12].mxu1 %vm1200_vm2, %v1429_v48  ;;  %2224 = vmatmul.mubr.msk.bf16.vlgmr.msra.gmra.mrb[16].mxu0 %vm1200_vm2, %v1430_v49 }
 0x4c0   : > { %2228 = vmatpush3.bf16.msra.mxu1 %v1530_v40  ;;  %2234 = vmatpush3.bf16.msra.mxu0 %v1576_v41 }
 0x4c1   : > { %2229 = vmatprep.mubr.msk.bf16.mxu1 %vm2789_vm0, %v2788_v0  ;;  %2235 = vmatprep.mubr.msk.bf16.mxu0 %vm2789_vm0, %v2788_v0 }
 0x4c2   : > { %2239 = vmatprep.subr.bf16.mxu1 %v2788_v0 }
 0x4d6   : > { %v1417_v50 = vpop.xlane.xlu1 %1416 }
 0x4d7   : > { %2407 = vrcp.f32 %v1417_v50  ;;  %v1420_v53 = vpop.xlane.xlu0 %1419 }
 0x4d8   : > { %2409 = vrcp.f32 %v1420_v53 }
 0x4e1   : > { %v2408_v54 = vpop.eup %2407 }
 0x4e2   : > { %v2410_v55 = vpop.eup %2409  ;;  %v1427_v56 = vmul.f32 %v2408_v54, %v3340_v51 }
 0x4e3   : > { %v1428_v57 = vmul.f32 %v2410_v55, %v3342_v52 }
 0x4e4   : > { %v1431_v58 = vpack.c.bf16 %v1427_v56, %v1427_v56 }
 0x4e5   : > { %v1432_v59 = vpack.c.bf16 %v1428_v57, %v1428_v57 }
 0x4e6   : > { %2230 = vmatmul.mubr.msk.bf16.vlgmr.msra.gmra.mrb[16].mxu1 %vm1200_vm2, %v1431_v58  ;;  %v2129_v58 = vld [vmem:[#allocation16 + $0x3] ss:$0 sm:$0xff] }
 0x4e7   : > { %2236 = vmatmul.mubr.msk.bf16.vlgmr.msra.gmra.mrb[20].mxu0 %vm1200_vm2, %v1432_v59  ;;  %2243 = vmatprep.mubr.msk.bf16.mxu1 %vm2789_vm0, %v2788_v0 }
 0x4e8   : > { %2240 = vmatpush3.bf16.msra.mxu1 %v2393_v24 }
 0x4e9   : > { %2241 = vmatprep.subr.bf16.mxu1 %v2788_v0 }
 0x4ec   : > { %2242 = vmatpush3.bf16.msra.mxu1 %v2394_v33 }
 0x592   : > { %v1474_v60 = vpop.f32.mrb[12].mxu1  ;;  %v1520_v61 = vpop.f32.mrb[16].mxu0 }
 0x593   : > { %v2219_v62 = vpop.f32.mrb[13].mxu1  ;;  %v2225_v63 = vpop.f32.mrb[17].mxu0 }
 0x594   : > { %v1477_v1 = vpop.f32.mrb[14].mxu1  ;;  %v1523_v2 = vpop.f32.mrb[18].mxu0 }
 0x595   : > { %v2220_v3 = vpop.f32.mrb[15].mxu1  ;;  %v2226_v4 = vpop.f32.mrb[19].mxu0 }
 0x5b9   : > { %v1566_v51 = vpop.f32.mrb[16].mxu1 }
 0x5ba   : > { %v1618_v5 = vcombine.low %v1474_v60, %v1566_v51  ;;  %v1619_v52 = vcombine.high %v1474_v60, %v1566_v51  ;;  %v1612_v6 = vpop.f32.mrb[20].mxu0  ;;  %v2231_v8 = vpop.f32.mrb[17].mxu1 }
 0x5bb   : > { %v1634_v9 = vcombine.low %v1520_v61, %v1612_v6  ;;  %v1635_v10 = vcombine.high %v1520_v61, %v1612_v6  ;;  %v2237_v11 = vpop.f32.mrb[21].mxu0  ;;  %v1569_v12 = vpop.f32.mrb[18].mxu1 }
 0x5bc   : > { %v1626_v13 = vrot.slane %v1618_v5, %v3269_v39  ;;  %v1633_v14 = vrot.slane %v1619_v52, %v3269_v39  ;;  %v1615_v15 = vpop.f32.mrb[22].mxu0  ;;  %v2232_v16 = vpop.f32.mrb[19].mxu1  ;;  %v2134_v12 = vld [vmem:[#allocation16 + $0x5] ss:$0 sm:$0xff] }
 0x5bd   : > { %v1642_v17 = vrot.slane %v1634_v9, %v3269_v39  ;;  %v1649_v18 = vrot.slane %v1635_v10, %v3269_v39  ;;  %v2238_v19 = vpop.f32.mrb[23].mxu0 }
 0x5bf   : > { %v1650_v20 = vcombine.low %v1626_v13, %v1642_v17  ;;  %v1651_v21 = vcombine.high %v1626_v13, %v1642_v17  ;;  %v1666_v22 = vcombine.low %v1633_v14, %v1649_v18  ;;  %v1667_v23 = vcombine.high %v1633_v14, %v1649_v18 }
 0x5c1   : > { %v1658_v25 = vrot.slane %v1650_v20, %v3271_v46  ;;  %v1665_v26 = vrot.slane %v1651_v21, %v3271_v46  ;;  %v1674_v27 = vrot.slane %v1666_v22, %v3271_v46  ;;  %v1681_v28 = vrot.slane %v1667_v23, %v3271_v46 }
 0x5c3   : > { %v1686_v29 = vcombine.low %v1658_v25, %v1665_v26  ;;  %v2127_v30 = vcombine.high %v1658_v25, %v1665_v26  ;;  %v1702_v31 = vcombine.low %v1674_v27, %v1681_v28  ;;  %v2128_v32 = vcombine.high %v1674_v27, %v1681_v28 }
 0x5c5   : > { %v1693_v34 = vrot.slane %v1686_v29, %v3269_v39  ;;  %v1701_v35 = vrot.slane %v2127_v30, %v3269_v39  ;;  %v1709_v36 = vrot.slane %v1702_v31, %v3269_v39  ;;  %v1717_v37 = vrot.slane %v2128_v32, %v3269_v39 }
 0x5c7   : > { %v1719_v38 = vcombine.high %v1693_v34, %v1701_v35  ;;  %v1735_v42 = vcombine.high %v1709_v36, %v1717_v37  ;;  %v1718_v43 = vcombine.low %v1693_v34, %v1701_v35  ;;  %v1734_v44 = vcombine.low %v1709_v36, %v1717_v37 }
 0x5c9   : > { %v1733_v0 = vrot.slane %v1719_v38, %v3271_v46  ;;  %v1749_v45 = vrot.slane %v1735_v42, %v3271_v46  ;;  %v1726_v47 = vrot.slane %v1718_v43, %v3271_v46  ;;  %v1742_v48 = vrot.slane %v1734_v44, %v3271_v46 }
 0x5cb   : > { %v1752_v49 = vcombine.low %v1733_v0, %v1749_v45  ;;  %v1751_v40 = vcombine.high %v1726_v47, %v1742_v48  ;;  %v1753_v41 = vcombine.high %v1733_v0, %v1749_v45  ;;  %v1750_v50 = vcombine.low %v1726_v47, %v1742_v48 }
 0x5cd   : > { %1759 = vrot.lane.b32.xlu1 %v1752_v49, %s2795_s5  ;;  %1755 = vrot.lane.b32.xlu0 %v1751_v40, %s2796_s18 }
 0x5d1   : > { %1763 = vrot.lane.b32.xlu1 %v1753_v41, %s2797_s24 }
 0x63f   : > { %v1760_v39 = vpop.permute.xlu1 %1759  ;;  %v1756_v53 = vpop.permute.xlu0 %1755 }
 0x640   : > { %v1766_v54 = vsel %vm1200_vm2, %v1750_v50, %v1756_v53 }
 0x641   : > { %v1768_v56 = vsel %vm1767_vm4, %v1766_v54, %v1760_v39 }
 0x643   : > { %v1764_v55 = vpop.permute.xlu1 %1763 }
 0x644   : > { %v1770_v57 = vsel %vm1769_vm5, %v1768_v56, %v1764_v55 }
 0x645   : > { %v1771_v46 = vpack.c.bf16 %v1770_v57, %v1770_v57 }
 0x647   : > { %2244 = vmatmul.mubr.msk.bf16.vlgmr.msra.gmra.mrb[20].mxu1 %vm577_vm1, %v1771_v46 }
 0x71a   : > { %v1830_v59 = vpop.f32.mrb[20].mxu1 }
 0x71b   : > { %v1831_v60 = vadd.f32 %v2129_v58, %v1830_v59  ;;  %v2245_v61 = vpop.f32.mrb[21].mxu1 }
 0x71c   : > { %v1833_v62 = vpop.f32.mrb[22].mxu1 }
 0x71d   : > { %v2246_v63 = vpop.f32.mrb[23].mxu1  ;;  %v1836_v1 = vadd.f32 %v1831_v60, %v3245_v7  ;;  %v2133_v7 = vld [vmem:[#allocation16 + $0x4] ss:$0 sm:$0xff] }
 0x71f   : > { %v1839_v2 = vsel %vm577_vm1, %v1836_v1, 0.0 }
 0x720   : > { %1840 = vadd.xlane.f32.xlu0 %v1839_v2 }
 0x7ad   : > { %v1841_v3 = vpop.xlane.xlu0 %1840 }
 0x7ae   : > { %v1843_v4 = vmul.f32 0.03125, %v1841_v3 }
 0x7b0   : > { %v1844_v51 = vsub.f32 %v1836_v1, %v1843_v4 }
 0x7b2   : > { %v1845_v5 = vmul.f32 %v1844_v51, %v1844_v51 }
 0x7b4   : > { %v1846_v52 = vsel %vm577_vm1, %v1845_v5, 0.0 }
 0x7b5   : > { %1847 = vadd.xlane.f32.xlu1 %v1846_v52 }
 0x842   : > { %v1848_v6 = vpop.xlane.xlu1 %1847 }
 0x843   : > { %v1849_v8 = vmul.f32 0.03125, %v1848_v6 }
 0x845   : > { %v1850_v9 = vadd.f32 1e-05, %v1849_v8 }
 0x847   : > { %2411 = vrsqrt.f32 %v1850_v9 }
 0x851   : > { %v2412_v10 = vpop.eup %2411 }
 0x852   : > { %v1852_v11 = vmul.f32 %v2412_v10, %v1844_v51 }
 0x854   : > { %v1857_v13 = vmul.f32 %v2133_v7, %v1852_v11 }
 0x856   : > { %v1862_v14 = vadd.f32 %v2134_v12, %v1857_v13 }
 0x858   : > { %1863 = vst.msk [vmem:[%s545_s27] sm:$0xff] %vm577_vm1, %v1862_v14 }
 0x859   : > { %2686 = shalt.err (!%p2683_p8)
}
 0x85a   : > { %s2687_s7 = scalar_lea.hbm %s3412_s26, 128  ;;  %s2691_s15 = scalar_lea.hbm %s3540_s1, 256 }
 0x85b   : > { %p2688_p10 = scmp.ne.s32.totalorder %s3412_s26, %s2687_s7  ;;  %p2692_p6 = scmp.lt.u32.totalorder %s3412_s26, %s3540_s1 }
 0x85c   : > { %p2693_p3 = scmp.lt.u32.totalorder %s2691_s15, %s2687_s7  ;;  %p2695_p1 = scmp.lt.u32.totalorder %s2687_s7, %s3412_s26 }
 0x85d   : > { %p2689_p7 = pnand %p2688_p10, %p3541_p9 }
 0x85e   : > { %p2694_p5 = por %p2693_p3, %p2692_p6 }
 0x85f   : > { %p2690_p12 = pneg %p2689_p7 }
 0x860   : > { %p2696_p2 = por %p2695_p1, %p2694_p5 }
 0x862   : > { %p2697_p0 = pnand %p2696_p2, %p2690_p12 }
 0x864   : > { %2700 = shalt.err (!%p2697_p0)
}
 0x865   : > { %2275 = dma.vmem_to_hbm [thread:$0]  (%p3541_p9), %s3414_s28, 128, %s3412_s26, %s1865_s12  }
 0x866 PF: > { %s3542_s5 = sld [smem:[#allocation25_spill]]  ;;  %s3543_s18 = sld [smem:[#allocation31_spill]] }
 0x867   : > { %p3545_p13 = scmp.ge.s32.totalorder %s2775_s14, 2 }
 0x86c   : > { %s1891_s24 = sand.u32 1, %s3542_s5   ;;  %p3544_p4 = scmp.ne.s32.totalorder %s3543_s18, 0 }
 0x86d   : > { %s1892_s9 = scalar_lea.sflag [#allocation4], %s1891_s24 }
 0x86e   : > { %p2307_p11 = pnand %p3545_p13, %p3544_p4 }
 0x870   : > { %2750 = dma.done.wait (!%p2307_p11), %s1892_s9, 128  }
 0x871   : > { %2752 = vsyncadd (!%p2307_p11), %s1892_s9, 4294967168  ;;  %s33_s14 = sadd.s32 1, %s2775_s14   ;;  %s3546_s17 = sld [smem:[#allocation30_spill]] }
 0x872   : > { %p30_p8 = scmp.ge.s32.totalorder %s33_s14, 4   ;;  %s3547_s12 = sld [smem:[#allocation27_spill]] }
 0x873   : > { %s3548_s13 = sld [smem:[#allocation29_spill]]  ;;  %s3549_s30 = smov %s2759_s10 }
 0x874   : > { %s3550_s10 = smov %s2763_s11  ;;  %32 = sbr.rel (!%p30_p8) target bundleno = 18 (0x12), region = 158 }
 0x877   : > { %s3551_s11 = smov %s3546_s17 }
 0x87b   :  { %1897 = vsyncpa [#allocation3], 1 }
 0x87c   :  { %1899 = vsyncpa [#allocation3 + $0x1], 1 }
 0x87d   :  { %1900 = vsyncpa [#allocation6], 1 }
 0x87e   :  { %1902 = vsyncpa [#allocation6 + $0x1], 1 }
 0x87f   :  { %1903 = vsyncpa [#allocation9], 1 }
 0x880   :  { %1905 = vsyncpa [#allocation9 + $0x1], 1 }
 0x881   :  { %1906 = vsyncpa [#allocation12], 1 }
 0x882   :  { %1907 = vsyncpa [#allocation15], 1 }
 0x883   :  { %1908 = vsyncpa [#allocation4], 1 }
 0x884   :  { %1910 = vsyncpa [#allocation4 + $0x1], 1 }

</bundles_post_ra>
